<compile_context>
chip_gen: v7x
topology: tpu7x:2x2x1
jax: 0.10.0
libtpu: 0.0.40
codegen_flags: <defaults>
</compile_context>

<pallas_src>
import math
import jax
import jax.numpy as jnp
from jax.experimental import pallas as pl
from jax.experimental.pallas import tpu as pltpu


# ----------------------------- Pallas kernel --------------------------------

def _rgcn_matmul_kernel(xcat_ref, w_ref, b_ref, o_ref):
    # (tile_m, K) bf16 @ (K, D) bf16 on the MXU, f32 accumulation,
    # fused bias add + relu on the VPU, f32 store.
    acc = jnp.dot(xcat_ref[...], w_ref[...], preferred_element_type=jnp.float32)
    acc = acc + b_ref[...]
    o_ref[...] = jnp.maximum(acc, 0.0).astype(o_ref.dtype)


def rgcn_relu_matmul(xcat, wcat, bias, *, tile_m=1024):
    """out = relu(xcat @ wcat + bias), tiled over node rows.

    xcat: (Np, K) bf16 with Np % tile_m == 0 (rows already grid-aligned).
    wcat: (K, D)  f32 (cast to bf16 here; tiny, stays resident in VMEM).
    bias: (D,)    f32.
    """
    Np, K = xcat.shape
    K2, D = wcat.shape
    assert K == K2 and Np % tile_m == 0
    bias2d = bias.reshape(1, D).astype(jnp.float32)
    wcat_bf16 = wcat.astype(jnp.bfloat16)

    cost = pl.CostEstimate(
        flops=2 * Np * K * D,
        transcendentals=0,
        bytes_accessed=(Np * K * xcat.dtype.itemsize   # XCAT stream (dominant)
                        + K * D * 2                    # resident bf16 weights
                        + Np * D * 4                   # f32 output
                        + D * 4),                      # bias
    )

    out = pl.pallas_call(
        _rgcn_matmul_kernel,
        out_shape=jax.ShapeDtypeStruct((Np, D), jnp.float32),
        grid_spec=pl.GridSpec(
            grid=(Np // tile_m,),
            in_specs=[
                pl.BlockSpec((tile_m, K), lambda i: (i, 0)),   # node tile of XCAT
                pl.BlockSpec((K, D), lambda i: (0, 0)),        # fused weight (resident)
                pl.BlockSpec((1, D), lambda i: (0, 0)),        # bias row
            ],
            out_specs=pl.BlockSpec((tile_m, D), lambda i: (i, 0)),
        ),
        compiler_params=pltpu.CompilerParams(
            dimension_semantics=("parallel",)),
        cost_estimate=cost,
    )(xcat, wcat_bf16, bias2d)
    return out


# ------------------------- parameter initialization -------------------------

def init_graph_embedder(key, num_nodes, embed_size, num_relations, num_bases):
    """Deterministic synthetic init mirroring Graph_Embedder.initialize_weights
    plus RGCNConv's (basis, comp, root, bias) parameters."""
    k1, k2, k3, k4 = jax.random.split(key, 4)
    inv = 1.0 / math.sqrt(embed_size)
    feats = jax.random.uniform(k1, (num_nodes, embed_size), jnp.float32, -inv, inv)
    # torch.nn.functional.normalize(p=2, dim=1, eps=1e-12)
    feats = feats / jnp.maximum(
        jnp.linalg.norm(feats, axis=1, keepdims=True), 1e-12)

    def glorot(k, shape):
        fan = shape[-2] + shape[-1]
        std = math.sqrt(6.0 / fan)
        return jax.random.uniform(k, shape, jnp.float32, -std, std)

    basis = glorot(k2, (num_bases, embed_size, embed_size))   # (B, D, D)
    comp = glorot(k3, (num_relations, num_bases))              # (R, B)
    root = glorot(k4, (embed_size, embed_size))                # (D, D)
    bias = jnp.zeros((embed_size,), jnp.float32)               # (D,)
    return dict(init_features=feats, basis=basis, comp=comp,
                root=root, bias=bias)


# --------------------------------- forward ----------------------------------

def graph_embedder_forward(params, edge_type, edge_index, num_relations,
                           *, tile_m=1024):
    """Matches Graph_Embedder.forward(edge_type, edge_index) with word_net=False."""
    x = params["init_features"]                  # (N, D) f32
    N, D = x.shape
    R = num_relations
    src = edge_index[0].astype(jnp.int32)        # edge_index.long()
    dst = edge_index[1].astype(jnp.int32)
    etype = edge_type.astype(jnp.int32)
    E = src.shape[0]

    R1 = R + 1                                   # root slot + R relation slots
    Np = pl.cdiv(N, tile_m) * tile_m             # row count aligned to the grid

    # Basis decomposition of per-relation weights (parameter-setup glue).
    w_rel = jnp.einsum("rb,bio->rio", params["comp"], params["basis"])  # (R, D, D)

    # --- Sparse neighbor aggregation (data-dependent gather/scatter: XLA glue) ---
    # Per-(relation, node) in-degree -> mean aggregation (PyG RGCNConv aggr='mean').
    edge_seg = dst * R1 + (etype + 1)            # slot 0 reserved for the root/self term
    deg = jax.ops.segment_sum(jnp.ones((E,), jnp.float32), edge_seg,
                              num_segments=Np * R1)
    inv_deg = 1.0 / jnp.maximum(deg, 1.0)

    # Build XCAT = [x | mean_agg_1 | ... | mean_agg_R] directly in its final
    # (Np, R1*D) layout AND final bf16 dtype: normalization is folded into the
    # edge messages so a single bf16 segment_sum produces the fused slab (no
    # pad / transpose / divide / cast passes; half the scatter+stream bytes).
    self_seg = jnp.arange(N, dtype=jnp.int32) * R1
    edge_msgs = (x[src] * inv_deg[edge_seg][:, None]).astype(jnp.bfloat16)
    msgs = jnp.concatenate([x.astype(jnp.bfloat16), edge_msgs], axis=0)
    segs = jnp.concatenate([self_seg, edge_seg])
    xcat = jax.ops.segment_sum(msgs, segs, num_segments=Np * R1)   # (Np*R1, D) bf16
    xcat = xcat.reshape(Np, R1 * D)

    # Fused weight slab [W_root; W_1; ...; W_R] -> (R1*D, D).
    wcat = jnp.concatenate([params["root"][None], w_rel], axis=0).reshape(R1 * D, D)

    # Hot path in Pallas: matmul + bias + relu.
    # TODO(synk): fuse the aggregation itself into the kernel (VMEM-resident X,
    # scalar-prefetched CSR edge offsets) to avoid materializing XCAT entirely.
    graph_features = rgcn_relu_matmul(xcat, wcat, params["bias"], tile_m=tile_m)
    graph_features = graph_features[:N]

    # word_net=False  ->  second output is None
    # TODO(synk): word_net=True branch (GCNConv over ConceptNet edges) needs
    # on-disk data and is not implemented here.
    return graph_features, None


# ----------------------------------- main ------------------------------------

if __name__ == "__main__":
    # Small shapes consistent with the module (defaults are 30471 nodes, D=64,
    # 12 relations, 30 bases -- scaled down here).
    num_nodes, embed_size = 256, 64
    num_relations, num_bases = 4, 3
    num_edges = 512

    key = jax.random.PRNGKey(0)
    kp, ke, kt = jax.random.split(key, 3)
    params = init_graph_embedder(kp, num_nodes, embed_size,
                                 num_relations, num_bases)
    edge_index = jax.random.randint(ke, (2, num_edges), 0, num_nodes,
                                    dtype=jnp.int32)
    edge_type = jax.random.randint(kt, (num_edges,), 0, num_relations,
                                   dtype=jnp.int32)

    fwd = jax.jit(lambda p, et, ei: graph_embedder_forward(
        p, et, ei, num_relations, tile_m=1024))
    graph_features, word_features = fwd(params, edge_type, edge_index)
    jax.block_until_ready(graph_features)

    assert graph_features.shape == (num_nodes, embed_size)
    assert graph_features.dtype == jnp.float32
    assert word_features is None
    assert bool(jnp.all(graph_features >= 0.0))  # relu applied
    assert bool(jnp.all(jnp.isfinite(graph_features)))
    print("KERNEL_OK")
</pallas_src>

<mosaic_0001>
module attributes {stable_mosaic.version = 11 : i64} {
  func.func private @main(%arg0: i32) attributes {dimension_semantics = [#tpu.dimension_semantics<core_parallel>], iteration_bounds = array<i64: 2>, tpu.core_type = #tpu.core_type<sc_scalar_subcore>, window_params = []} {
    return
  }
}

module attributes {stable_mosaic.version = 11 : i64} {
  func.func private @main(%arg0: i32) attributes {dimension_semantics = [#tpu.dimension_semantics<core_parallel>], iteration_bounds = array<i64: 2>, tpu.core_type = #tpu.core_type<sc_scalar_subcore>, window_params = []} {
    return
  }
}

module attributes {stable_mosaic.version = 11 : i64} {
  func.func @_rgcn_matmul_kernel(%arg0: i32, %arg1: memref<1024x320xbf16, #tpu.memory_space<vmem>>, %arg2: memref<320x64xbf16, #tpu.memory_space<vmem>>, %arg3: memref<1x64xf32, #tpu.memory_space<vmem>>, %arg4: memref<1024x64xf32, #tpu.memory_space<vmem>>) attributes {dimension_semantics = [#tpu.dimension_semantics<parallel>], iteration_bounds = array<i64: 1>, scalar_prefetch = 0 : i64, scratch_operands = 0 : i64, tpu.core_type = #tpu.core_type<tc>, window_params = [{transform_indices = @transform_0, window_bounds = array<i64: 1024, 320>}, {pipeline_mode = #tpu.pipeline_mode<synchronous>, transform_indices = @transform_1, window_bounds = array<i64: 320, 64>}, {pipeline_mode = #tpu.pipeline_mode<synchronous>, transform_indices = @transform_2, window_bounds = array<i64: 1, 64>}, {transform_indices = @transform_3, window_bounds = array<i64: 1024, 64>}]} {
    %c0 = arith.constant 0 : index
    %c0_0 = arith.constant 0 : index
    %0 = vector.load %arg1[%c0, %c0_0] : memref<1024x320xbf16, #tpu.memory_space<vmem>>, vector<1024x320xbf16>
    %c0_1 = arith.constant 0 : index
    %c0_2 = arith.constant 0 : index
    %1 = vector.load %arg2[%c0_1, %c0_2] : memref<320x64xbf16, #tpu.memory_space<vmem>>, vector<320x64xbf16>
    %cst = arith.constant dense<0.000000e+00> : vector<1024x64xf32>
    %2 = tpu.matmul %0, %1, %cst {dimension_numbers = #tpu.dot_dimension_numbers<[1], [0], [0], [1], [0, 0, 1, 1], [], []>} : vector<1024x320xbf16>, vector<320x64xbf16>, vector<1024x64xf32> -> vector<1024x64xf32>
    %c0_3 = arith.constant 0 : index
    %c0_4 = arith.constant 0 : index
    %3 = vector.load %arg3[%c0_3, %c0_4] : memref<1x64xf32, #tpu.memory_space<vmem>>, vector<1x64xf32>
    %4 = vector.broadcast %3 : vector<1x64xf32> to vector<1024x64xf32>
    %5 = arith.addf %2, %4 : vector<1024x64xf32>
    %cst_5 = arith.constant 0.000000e+00 : f32
    %6 = vector.broadcast %cst_5 : f32 to vector<1024x64xf32>
    %7 = arith.maximumf %5, %6 : vector<1024x64xf32>
    %c0_6 = arith.constant 0 : index
    %c0_7 = arith.constant 0 : index
    %8 = vector.load %arg4[%c0_6, %c0_7] : memref<1024x64xf32, #tpu.memory_space<vmem>>, vector<1024x64xf32>
    tpu.vector_store %arg4[%c0_6, %c0_7], %7 {strides = array<i32>} : memref<1024x64xf32, #tpu.memory_space<vmem>>, vector<1024x64xf32>,
    return
  }
  func.func @transform_0(%arg0: i32) -> (i32, i32) {
    %c0_i32 = arith.constant 0 : i32
    %c0_i32_0 = arith.constant 0 : i32
    return %arg0, %c0_i32 : i32, i32
  }
  func.func @transform_1(%arg0: i32) -> (i32, i32) {
    %c0_i32 = arith.constant 0 : i32
    %c0_i32_0 = arith.constant 0 : i32
    %c0_i32_1 = arith.constant 0 : i32
    return %c0_i32, %c0_i32_0 : i32, i32
  }
  func.func @transform_2(%arg0: i32) -> (i32, i32) {
    %c0_i32 = arith.constant 0 : i32
    %c0_i32_0 = arith.constant 0 : i32
    %c0_i32_1 = arith.constant 0 : i32
    return %c0_i32, %c0_i32_0 : i32, i32
  }
  func.func @transform_3(%arg0: i32) -> (i32, i32) {
    %c0_i32 = arith.constant 0 : i32
    %c0_i32_0 = arith.constant 0 : i32
    return %arg0, %c0_i32 : i32, i32
  }
}

</mosaic_0001>

<bundles_post_ra>
// kernel: _lambda_.1
= control target key start
LH: loop header
LB: loop body
LE: loop exit
PB: predicated region body
PF: predicated region fallthrough
CT: control target
= control target key end

     0   :  { %v3732_v0 = vmov 0   ;;  %vm1398_vm0 = vcmask 523264   ;;  %s5447_s1 = inlined_call_operand.vmem [shape: bf16[320,64], index: 1, kind: input, shape index: {}]   ;;  %s5448_s0 = inlined_call_operand.vmem [shape: bf16[1024,320], index: 0, kind: input, shape index: {}]   ;;  %s5449_s2 = inlined_call_operand.vmem [shape: f32[1,64], index: 2, kind: input, shape index: {}]   ;;  %s5450_s3 = inlined_call_operand.vmem [shape: f32[1024,64], index: 3, kind: output, shape index: {}]  }
   0x1   :  { %1591 = vmatprep.subr.bf16.mxu0 %v3732_v0  ;;  %3422 = vmatprep.subr.bf16.mxu1 %v3732_v0  ;;  %v3455_v1 = vld [vmem:[%s5447_s1] sm:$0xff]   ;;  %v3456_v2 = vld [vmem:[%s5447_s1 + $0x8] sm:$0xff]   ;;  %v3457_v3 = vld [vmem:[%s5447_s1 + $0x10] sm:$0xff]  }
   0x2   :  { %1592 = vmatpush1.bf16.msra.mxu0 %v3455_v1  ;;  %3438 = vmatpush1.bf16.msra.mxu1 %v3455_v1  ;;  %v3458_v4 = vld [vmem:[%s5447_s1 + $0x18] sm:$0xff]   ;;  %v3459_v5 = vld [vmem:[%s5447_s1 + $0x20] sm:$0xff]   ;;  %v3460_v7 = vld [vmem:[%s5447_s1 + $0x28] sm:$0xff]  }
   0x3   :  { %1593 = vmatprep.subr.bf16.mxu0 %v3732_v0  ;;  %3423 = vmatprep.subr.bf16.mxu1 %v3732_v0  ;;  %v3473_v6 = vld [vmem:[%s5448_s0 + $0x4] ss:$12 sps:$4 sm:$0xff]   ;;  %v3462_v10 = vld [vmem:[%s5447_s1 + $0x38] sm:$0xff]   ;;  %v3464_v12 = vld [vmem:[%s5447_s1 + $0x48] sm:$0xff]  }
   0x4   :  { %v3476_v8 = vld [vmem:[%s5448_s0 + $0x484] ss:$12 sps:$4 sm:$0xff]   ;;  %1623 = vmatprep.mubr.bf16.mxu0 %v3473_v6  ;;  %v3466_v14 = vld [vmem:[%s5447_s1 + $0x58] sm:$0xff]   ;;  %v3468_v16 = vld [vmem:[%s5447_s1 + $0x68] sm:$0xff]  }
   0x5   :  { %2007 = vmatprep.mubr.bf16.mxu1 %v3476_v8  ;;  %v3461_v9 = vld [vmem:[%s5447_s1 + $0x30] sm:$0xff]   ;;  %v3463_v11 = vld [vmem:[%s5447_s1 + $0x40] sm:$0xff]   ;;  %v3470_v18 = vld [vmem:[%s5447_s1 + $0x78] sm:$0xff]  }
   0x6   :  { %1594 = vmatpush1.bf16.msra.mxu0 %v3456_v2  ;;  %3439 = vmatpush1.bf16.msra.mxu1 %v3456_v2  ;;  %v3465_v13 = vld [vmem:[%s5447_s1 + $0x50] sm:$0xff]   ;;  %v3467_v15 = vld [vmem:[%s5447_s1 + $0x60] sm:$0xff]   ;;  %v3478_v22 = vld [vmem:[%s5448_s0 + $0x1c] ss:$12 sps:$4 sm:$0xff]  }
   0x7   :  { %1595 = vmatprep.subr.bf16.mxu0 %v3732_v0  ;;  %3424 = vmatprep.subr.bf16.mxu1 %v3732_v0  ;;  %v3469_v17 = vld [vmem:[%s5447_s1 + $0x70] sm:$0xff]   ;;  %v3477_v19 = vld [vmem:[%s5447_s1 + $0x80] sm:$0xff]   ;;  %v3480_v23 = vld [vmem:[%s5448_s0 + $0x49c] ss:$12 sps:$4 sm:$0xff]  }
   0x8   :  { %v3471_v20 = vld [vmem:[%s5448_s0] ss:$12 sps:$4 sm:$0xff]   ;;  %v3482_v25 = vld [vmem:[%s5448_s0 + $0x18] ss:$12 sps:$4 sm:$0xff]   ;;  %v3527_v27 = vld [vmem:[%s5447_s1 + $0x90] sm:$0xff]  }
   0x9   :  { %v3474_v21 = vld [vmem:[%s5448_s0 + $0x480] ss:$12 sps:$4 sm:$0xff]   ;;  %v3483_v26 = vld [vmem:[%s5448_s0 + $0x498] ss:$12 sps:$4 sm:$0xff]   ;;  %v3488_v31 = vld [vmem:[%s5448_s0 + $0x30] ss:$12 sps:$4 sm:$0xff]  }
   0xa   :  { %1596 = vmatpush1.bf16.msra.mxu0 %v3457_v3  ;;  %3440 = vmatpush1.bf16.msra.mxu1 %v3457_v3  ;;  %v3502_v24 = vld [vmem:[%s5447_s1 + $0x88] sm:$0xff]   ;;  %v3484_v28 = vld [vmem:[%s5448_s0 + $0x34] ss:$12 sps:$4 sm:$0xff]   ;;  %v3552_v30 = vld [vmem:[%s5447_s1 + $0x98] sm:$0xff]  }
   0xb   :  { %1597 = vmatprep.subr.bf16.mxu0 %v3732_v0  ;;  %3425 = vmatprep.subr.bf16.mxu1 %v3732_v0  ;;  %v3486_v29 = vld [vmem:[%s5448_s0 + $0x4b4] ss:$12 sps:$4 sm:$0xff]   ;;  %v3489_v32 = vld [vmem:[%s5448_s0 + $0x4b0] ss:$12 sps:$4 sm:$0xff]   ;;  %v3490_v33 = vld [vmem:[%s5448_s0 + $0x4c] ss:$12 sps:$4 sm:$0xff]  }
   0xc   :  { %v3492_v34 = vld [vmem:[%s5448_s0 + $0x4cc] ss:$12 sps:$4 sm:$0xff]   ;;  %v3494_v35 = vld [vmem:[%s5448_s0 + $0x48] ss:$12 sps:$4 sm:$0xff]   ;;  %v3496_v37 = vld [vmem:[%s5448_s0 + $0x64] ss:$12 sps:$4 sm:$0xff]  }
   0xd   :  { %v3495_v36 = vld [vmem:[%s5448_s0 + $0x4c8] ss:$12 sps:$4 sm:$0xff]   ;;  %v3498_v38 = vld [vmem:[%s5448_s0 + $0x4e4] ss:$12 sps:$4 sm:$0xff]   ;;  %v3500_v39 = vld [vmem:[%s5448_s0 + $0x60] ss:$12 sps:$4 sm:$0xff]  }
   0xe   :  { %1598 = vmatpush1.bf16.msra.mxu0 %v3458_v4  ;;  %3441 = vmatpush1.bf16.msra.mxu1 %v3458_v4  ;;  %v3501_v40 = vld [vmem:[%s5448_s0 + $0x4e0] ss:$12 sps:$4 sm:$0xff]   ;;  %v3503_v41 = vld [vmem:[%s5448_s0 + $0x7c] ss:$12 sps:$4 sm:$0xff]   ;;  %v3507_v43 = vld [vmem:[%s5448_s0 + $0x78] ss:$12 sps:$4 sm:$0xff]  }
   0xf   :  { %1599 = vmatprep.subr.bf16.mxu0 %v3732_v0  ;;  %3426 = vmatprep.subr.bf16.mxu1 %v3732_v0  ;;  %v3505_v42 = vld [vmem:[%s5448_s0 + $0x4fc] ss:$12 sps:$4 sm:$0xff]   ;;  %v3508_v44 = vld [vmem:[%s5448_s0 + $0x4f8] ss:$12 sps:$4 sm:$0xff]   ;;  %v3509_v45 = vld [vmem:[%s5448_s0 + $0x94] ss:$12 sps:$4 sm:$0xff]  }
  0x10   :  { %v3511_v46 = vld [vmem:[%s5448_s0 + $0x514] ss:$12 sps:$4 sm:$0xff]   ;;  %v3513_v47 = vld [vmem:[%s5448_s0 + $0x90] ss:$12 sps:$4 sm:$0xff]   ;;  %v3515_v49 = vld [vmem:[%s5448_s0 + $0xac] ss:$12 sps:$4 sm:$0xff]  }
  0x11   :  { %v3514_v48 = vld [vmem:[%s5448_s0 + $0x510] ss:$12 sps:$4 sm:$0xff]   ;;  %v3517_v50 = vld [vmem:[%s5448_s0 + $0x52c] ss:$12 sps:$4 sm:$0xff]   ;;  %v3519_v51 = vld [vmem:[%s5448_s0 + $0xa8] ss:$12 sps:$4 sm:$0xff]  }
  0x12   :  { %1600 = vmatpush1.bf16.msra.mxu0 %v3459_v5  ;;  %3442 = vmatpush1.bf16.msra.mxu1 %v3459_v5  ;;  %v3520_v52 = vld [vmem:[%s5448_s0 + $0x528] ss:$12 sps:$4 sm:$0xff]   ;;  %v3521_v53 = vld [vmem:[%s5448_s0 + $0xc4] ss:$12 sps:$4 sm:$0xff]   ;;  %v3525_v55 = vld [vmem:[%s5448_s0 + $0xc0] ss:$12 sps:$4 sm:$0xff]  }
  0x13   :  { %1601 = vmatprep.subr.bf16.mxu0 %v3732_v0  ;;  %3427 = vmatprep.subr.bf16.mxu1 %v3732_v0  ;;  %v3523_v54 = vld [vmem:[%s5448_s0 + $0x544] ss:$12 sps:$4 sm:$0xff]   ;;  %v3526_v56 = vld [vmem:[%s5448_s0 + $0x540] ss:$12 sps:$4 sm:$0xff]   ;;  %v3528_v57 = vld [vmem:[%s5448_s0 + $0xdc] ss:$12 sps:$4 sm:$0xff]  }
  0x14   :  { %v3530_v58 = vld [vmem:[%s5448_s0 + $0x55c] ss:$12 sps:$4 sm:$0xff]   ;;  %v3532_v59 = vld [vmem:[%s5448_s0 + $0xd8] ss:$12 sps:$4 sm:$0xff]   ;;  %v3534_v61 = vld [vmem:[%s5448_s0 + $0xf4] ss:$12 sps:$4 sm:$0xff]  }
  0x15   :  { %v3533_v60 = vld [vmem:[%s5448_s0 + $0x558] ss:$12 sps:$4 sm:$0xff]   ;;  %v3536_v62 = vld [vmem:[%s5448_s0 + $0x574] ss:$12 sps:$4 sm:$0xff]   ;;  %v3538_v63 = vld [vmem:[%s5448_s0 + $0xf0] ss:$12 sps:$4 sm:$0xff]  }
  0x16   :  { %1602 = vmatpush1.bf16.msra.mxu0 %v3460_v7  ;;  %3443 = vmatpush1.bf16.msra.mxu1 %v3460_v7  ;;  %v3540_v1 = vld [vmem:[%s5448_s0 + $0x10c] ss:$12 sps:$4 sm:$0xff]   ;;  %v3544_v3 = vld [vmem:[%s5448_s0 + $0x108] ss:$12 sps:$4 sm:$0xff]   ;;  %v3546_v5 = vld [vmem:[%s5448_s0 + $0x124] ss:$12 sps:$4 sm:$0xff]  }
  0x17   :  { %1603 = vmatprep.subr.bf16.mxu0 %v3732_v0  ;;  %3428 = vmatprep.subr.bf16.mxu1 %v3732_v0  ;;  %v3542_v2 = vld [vmem:[%s5448_s0 + $0x58c] ss:$12 sps:$4 sm:$0xff]   ;;  %v3545_v4 = vld [vmem:[%s5448_s0 + $0x588] ss:$12 sps:$4 sm:$0xff]   ;;  %v3548_v6 = vld [vmem:[%s5448_s0 + $0x5a4] ss:$12 sps:$4 sm:$0xff]  }
  0x18   :  { %v3550_v7 = vld [vmem:[%s5448_s0 + $0x120] ss:$12 sps:$4 sm:$0xff]  }
  0x19   :  { %v3551_v8 = vld [vmem:[%s5448_s0 + $0x5a0] ss:$12 sps:$4 sm:$0xff]  }
  0x1a   :  { %1604 = vmatpush1.bf16.msra.mxu0 %v3461_v9  ;;  %3444 = vmatpush1.bf16.msra.mxu1 %v3461_v9  ;;  %v3553_v9 = vld [vmem:[%s5448_s0 + $0x13c] ss:$12 sps:$4 sm:$0xff]  }
  0x1b   :  { %1605 = vmatprep.subr.bf16.mxu0 %v3732_v0  ;;  %3429 = vmatprep.subr.bf16.mxu1 %v3732_v0 }
  0x1e   :  { %1606 = vmatpush1.bf16.msra.mxu0 %v3462_v10  ;;  %3445 = vmatpush1.bf16.msra.mxu1 %v3462_v10  ;;  %v3555_v10 = vld [vmem:[%s5448_s0 + $0x5bc] ss:$12 sps:$4 sm:$0xff]  }
  0x1f   :  { %1607 = vmatprep.subr.bf16.mxu0 %v3732_v0  ;;  %3430 = vmatprep.subr.bf16.mxu1 %v3732_v0 }
  0x22   :  { %1608 = vmatpush1.bf16.msra.mxu0 %v3463_v11  ;;  %3446 = vmatpush1.bf16.msra.mxu1 %v3463_v11  ;;  %v3557_v11 = vld [vmem:[%s5448_s0 + $0x138] ss:$12 sps:$4 sm:$0xff]  }
  0x23   :  { %1609 = vmatprep.subr.bf16.mxu0 %v3732_v0  ;;  %3431 = vmatprep.subr.bf16.mxu1 %v3732_v0 }
  0x26   :  { %1610 = vmatpush1.bf16.msra.mxu0 %v3464_v12  ;;  %3447 = vmatpush1.bf16.msra.mxu1 %v3464_v12  ;;  %v3558_v12 = vld [vmem:[%s5448_s0 + $0x5b8] ss:$12 sps:$4 sm:$0xff]  }
  0x27   :  { %1611 = vmatprep.subr.bf16.mxu0 %v3732_v0  ;;  %3432 = vmatprep.subr.bf16.mxu1 %v3732_v0 }
  0x2a   :  { %1612 = vmatpush1.bf16.msra.mxu0 %v3465_v13  ;;  %3448 = vmatpush1.bf16.msra.mxu1 %v3465_v13  ;;  %v3559_v13 = vld [vmem:[%s5448_s0 + $0x154] ss:$12 sps:$4 sm:$0xff]  }
  0x2b   :  { %1613 = vmatprep.subr.bf16.mxu0 %v3732_v0  ;;  %3433 = vmatprep.subr.bf16.mxu1 %v3732_v0 }
  0x2e   :  { %1614 = vmatpush1.bf16.msra.mxu0 %v3466_v14  ;;  %3449 = vmatpush1.bf16.msra.mxu1 %v3466_v14  ;;  %v3561_v14 = vld [vmem:[%s5448_s0 + $0x5d4] ss:$12 sps:$4 sm:$0xff]  }
  0x2f   :  { %1615 = vmatprep.subr.bf16.mxu0 %v3732_v0  ;;  %3434 = vmatprep.subr.bf16.mxu1 %v3732_v0 }
  0x32   :  { %1616 = vmatpush1.bf16.msra.mxu0 %v3467_v15  ;;  %3450 = vmatpush1.bf16.msra.mxu1 %v3467_v15  ;;  %v3563_v15 = vld [vmem:[%s5448_s0 + $0x150] ss:$12 sps:$4 sm:$0xff]  }
  0x33   :  { %1617 = vmatprep.subr.bf16.mxu0 %v3732_v0  ;;  %3435 = vmatprep.subr.bf16.mxu1 %v3732_v0 }
  0x36   :  { %1618 = vmatpush1.bf16.msra.mxu0 %v3468_v16  ;;  %3451 = vmatpush1.bf16.msra.mxu1 %v3468_v16  ;;  %v3564_v16 = vld [vmem:[%s5448_s0 + $0x5d0] ss:$12 sps:$4 sm:$0xff]  }
  0x37   :  { %1619 = vmatprep.subr.bf16.mxu0 %v3732_v0  ;;  %3436 = vmatprep.subr.bf16.mxu1 %v3732_v0 }
  0x3a   :  { %1620 = vmatpush1.bf16.msra.mxu0 %v3469_v17  ;;  %3452 = vmatpush1.bf16.msra.mxu1 %v3469_v17  ;;  %v3565_v17 = vld [vmem:[%s5448_s0 + $0x16c] ss:$12 sps:$4 sm:$0xff]  }
  0x3b   :  { %1621 = vmatprep.subr.bf16.mxu0 %v3732_v0  ;;  %3437 = vmatprep.subr.bf16.mxu1 %v3732_v0  ;;  %v3539_v0 = vld [vmem:[%s5448_s0 + $0x570] ss:$12 sps:$4 sm:$0xff]  }
  0x3e   :  { %1622 = vmatpush1.bf16.msra.mxu0 %v3470_v18  ;;  %3453 = vmatpush1.bf16.msra.mxu1 %v3470_v18  ;;  %v3567_v18 = vld [vmem:[%s5448_s0 + $0x5ec] ss:$12 sps:$4 sm:$0xff]  }
  0x3f   :  { %3286 = vmatprep.subr.bf16.mxu1 %v3477_v19 }
  0x41   :  { %1624 = vmatmul.mubr.bf16.vlgmr.msra.gmra.mrb[0].mxu0 %v3471_v20  ;;  %2008 = vmatmul.mubr.bf16.vlgmr.msra.gmra.mrb[0].mxu1 %v3474_v21  ;;  %v3570_v20 = vld [vmem:[%s5448_s0 + $0x5e8] ss:$12 sps:$4 sm:$0xff]   ;;  %v3571_v21 = vld [vmem:[%s5448_s0 + $0x184] ss:$12 sps:$4 sm:$0xff]  }
  0x42   :  { %3287 = vmatpush3.bf16.msra.mxu1 %v3477_v19  ;;  %1631 = vmatprep.mubr.bf16.mxu0 %v3478_v22  ;;  %v3569_v19 = vld [vmem:[%s5448_s0 + $0x168] ss:$12 sps:$4 sm:$0xff]  }
  0x43   :  { %2015 = vmatprep.mubr.bf16.mxu1 %v3480_v23  ;;  %3288 = vmatprep.subr.bf16.mxu1 %v3502_v24  ;;  %v3573_v22 = vld [vmem:[%s5448_s0 + $0x8] ss:$12 sps:$4 sm:$0xff]   ;;  %v3574_v23 = vld [vmem:[%s5448_s0 + $0x180] ss:$12 sps:$4 sm:$0xff]  }
  0x46   :  { %3289 = vmatpush3.bf16.msra.mxu1 %v3502_v24  ;;  %v3575_v24 = vld [vmem:[%s5448_s0 + $0x20] ss:$12 sps:$4 sm:$0xff]  }
  0x47   :  { %3290 = vmatprep.subr.bf16.mxu1 %v3527_v27 }
  0x49   :  { %1632 = vmatmul.mubr.bf16.gmra.mrb[4].mxu0 %v3482_v25  ;;  %2016 = vmatmul.mubr.bf16.gmra.mrb[4].mxu1 %v3483_v26  ;;  %v3576_v25 = vld [vmem:[%s5448_s0 + $0x19c] ss:$12 sps:$4 sm:$0xff]   ;;  %v3578_v26 = vld [vmem:[%s5448_s0 + $0x38] ss:$12 sps:$4 sm:$0xff]  }
  0x4a   :  { %1639 = vmatprep.mubr.bf16.mxu0 %v3484_v28  ;;  %2023 = vmatprep.mubr.bf16.mxu1 %v3486_v29  ;;  %v3580_v28 = vld [vmem:[%s5448_s0 + $0x50] ss:$12 sps:$4 sm:$0xff]   ;;  %v3581_v29 = vld [vmem:[%s5448_s0 + $0x1b4] ss:$12 sps:$4 sm:$0xff]  }
  0x4b   :  { %3291 = vmatpush3.bf16.msra.mxu1 %v3527_v27  ;;  %v3579_v27 = vld [vmem:[%s5448_s0 + $0x198] ss:$12 sps:$4 sm:$0xff]  }
  0x4c   :  { %3292 = vmatprep.subr.bf16.mxu1 %v3552_v30 }
  0x4f   :  { %3293 = vmatpush3.bf16.msra.mxu1 %v3552_v30  ;;  %v3583_v30 = vld [vmem:[%s5448_s0 + $0x68] ss:$12 sps:$4 sm:$0xff]  }
  0x51   :  { %1640 = vmatmul.mubr.bf16.gmra.mrb[8].mxu0 %v3488_v31  ;;  %2024 = vmatmul.mubr.bf16.gmra.mrb[8].mxu1 %v3489_v32  ;;  %v3584_v31 = vld [vmem:[%s5448_s0 + $0x1b0] ss:$12 sps:$4 sm:$0xff]   ;;  %v3585_v32 = vld [vmem:[%s5448_s0 + $0x80] ss:$12 sps:$4 sm:$0xff]  }
  0x52   :  { %1647 = vmatprep.mubr.bf16.mxu0 %v3490_v33  ;;  %2031 = vmatprep.mubr.bf16.mxu1 %v3492_v34  ;;  %v3586_v33 = vld [vmem:[%s5448_s0 + $0x1cc] ss:$12 sps:$4 sm:$0xff]  }
  0x53   :  { %v3588_v34 = vld [vmem:[%s5448_s0 + $0x98] ss:$12 sps:$4 sm:$0xff]  }
  0x59   :  { %1648 = vmatmul.mubr.bf16.gmra.mrb[12].mxu0 %v3494_v35  ;;  %2032 = vmatmul.mubr.bf16.gmra.mrb[12].mxu1 %v3495_v36  ;;  %v3589_v35 = vld [vmem:[%s5448_s0 + $0x1c8] ss:$12 sps:$4 sm:$0xff]   ;;  %v3590_v36 = vld [vmem:[%s5448_s0 + $0xb0] ss:$12 sps:$4 sm:$0xff]  }
  0x5a   :  { %1655 = vmatprep.mubr.bf16.mxu0 %v3496_v37  ;;  %2039 = vmatprep.mubr.bf16.mxu1 %v3498_v38  ;;  %v3591_v37 = vld [vmem:[%s5448_s0 + $0x1e4] ss:$12 sps:$4 sm:$0xff]   ;;  %v3593_v38 = vld [vmem:[%s5448_s0 + $0xc8] ss:$12 sps:$4 sm:$0xff]  }
  0x61   :  { %1656 = vmatmul.mubr.bf16.gmra.mrb[16].mxu0 %v3500_v39  ;;  %2040 = vmatmul.mubr.bf16.gmra.mrb[16].mxu1 %v3501_v40  ;;  %v3594_v39 = vld [vmem:[%s5448_s0 + $0x1e0] ss:$12 sps:$4 sm:$0xff]  }
  0x62   :  { %1663 = vmatprep.mubr.bf16.mxu0 %v3503_v41  ;;  %2047 = vmatprep.mubr.bf16.mxu1 %v3505_v42  ;;  %v3595_v40 = vld [vmem:[%s5448_s0 + $0xe0] ss:$12 sps:$4 sm:$0xff]   ;;  %v3596_v41 = vld [vmem:[%s5448_s0 + $0x1fc] ss:$12 sps:$4 sm:$0xff]   ;;  %v3598_v42 = vld [vmem:[%s5448_s0 + $0xf8] ss:$12 sps:$4 sm:$0xff]  }
  0x69   :  { %1664 = vmatmul.mubr.bf16.gmra.mrb[20].mxu0 %v3507_v43  ;;  %2048 = vmatmul.mubr.bf16.gmra.mrb[20].mxu1 %v3508_v44  ;;  %v3599_v43 = vld [vmem:[%s5448_s0 + $0x1f8] ss:$12 sps:$4 sm:$0xff]   ;;  %v3600_v44 = vld [vmem:[%s5448_s0 + $0x110] ss:$12 sps:$4 sm:$0xff]  }
  0x6a   :  { %1671 = vmatprep.mubr.bf16.mxu0 %v3509_v45  ;;  %2055 = vmatprep.mubr.bf16.mxu1 %v3511_v46  ;;  %v3601_v45 = vld [vmem:[%s5448_s0 + $0x214] ss:$12 sps:$4 sm:$0xff]  }
  0x6b   :  { %v3603_v46 = vld [vmem:[%s5448_s0 + $0x128] ss:$12 sps:$4 sm:$0xff]  }
  0x71   :  { %1672 = vmatmul.mubr.bf16.gmra.mrb[24].mxu0 %v3513_v47  ;;  %2056 = vmatmul.mubr.bf16.gmra.mrb[24].mxu1 %v3514_v48  ;;  %v3604_v47 = vld [vmem:[%s5448_s0 + $0x210] ss:$12 sps:$4 sm:$0xff]   ;;  %v3605_v48 = vld [vmem:[%s5448_s0 + $0x140] ss:$12 sps:$4 sm:$0xff]  }
  0x72   :  { %1679 = vmatprep.mubr.bf16.mxu0 %v3515_v49  ;;  %2063 = vmatprep.mubr.bf16.mxu1 %v3517_v50  ;;  %v3606_v49 = vld [vmem:[%s5448_s0 + $0x22c] ss:$12 sps:$4 sm:$0xff]  }
  0x73   :  { %v3608_v50 = vld [vmem:[%s5448_s0 + $0x158] ss:$12 sps:$4 sm:$0xff]  }
  0x79   :  { %1680 = vmatmul.mubr.bf16.gmra.mrb[28].mxu0 %v3519_v51  ;;  %2064 = vmatmul.mubr.bf16.gmra.mrb[28].mxu1 %v3520_v52  ;;  %v3609_v51 = vld [vmem:[%s5448_s0 + $0x228] ss:$12 sps:$4 sm:$0xff]   ;;  %v3610_v52 = vld [vmem:[%s5448_s0 + $0x170] ss:$12 sps:$4 sm:$0xff]  }
  0x7a   :  { %1687 = vmatprep.mubr.bf16.mxu0 %v3521_v53  ;;  %2071 = vmatprep.mubr.bf16.mxu1 %v3523_v54  ;;  %v3611_v53 = vld [vmem:[%s5448_s0 + $0x244] ss:$12 sps:$4 sm:$0xff]   ;;  %v3613_v54 = vld [vmem:[%s5448_s0 + $0x188] ss:$12 sps:$4 sm:$0xff]  }
  0x81   :  { %1688 = vmatmul.mubr.bf16.gmra.mrb[32].mxu0 %v3525_v55  ;;  %2072 = vmatmul.mubr.bf16.gmra.mrb[32].mxu1 %v3526_v56  ;;  %v3614_v55 = vld [vmem:[%s5448_s0 + $0x240] ss:$12 sps:$4 sm:$0xff]  }
  0x82   :  { %1695 = vmatprep.mubr.bf16.mxu0 %v3528_v57  ;;  %2079 = vmatprep.mubr.bf16.mxu1 %v3530_v58  ;;  %v3615_v56 = vld [vmem:[%s5448_s0 + $0x1a0] ss:$12 sps:$4 sm:$0xff]   ;;  %v3616_v57 = vld [vmem:[%s5448_s0 + $0x25c] ss:$12 sps:$4 sm:$0xff]   ;;  %v3618_v58 = vld [vmem:[%s5448_s0 + $0x1b8] ss:$12 sps:$4 sm:$0xff]  }
  0x89   :  { %1696 = vmatmul.mubr.bf16.gmra.mrb[36].mxu0 %v3532_v59  ;;  %2080 = vmatmul.mubr.bf16.gmra.mrb[36].mxu1 %v3533_v60  ;;  %v3619_v59 = vld [vmem:[%s5448_s0 + $0x258] ss:$12 sps:$4 sm:$0xff]   ;;  %v3620_v60 = vld [vmem:[%s5448_s0 + $0x1d0] ss:$12 sps:$4 sm:$0xff]  }
  0x8a   :  { %1703 = vmatprep.mubr.bf16.mxu0 %v3534_v61  ;;  %2087 = vmatprep.mubr.bf16.mxu1 %v3536_v62  ;;  %v3621_v61 = vld [vmem:[%s5448_s0 + $0x274] ss:$12 sps:$4 sm:$0xff]  }
  0x8b   :  { %v3623_v62 = vld [vmem:[%s5448_s0 + $0x1e8] ss:$12 sps:$4 sm:$0xff]  }
  0x91   :  { %1704 = vmatmul.mubr.bf16.gmra.mrb[40].mxu0 %v3538_v63  ;;  %2088 = vmatmul.mubr.bf16.gmra.mrb[40].mxu1 %v3539_v0  ;;  %v3624_v63 = vld [vmem:[%s5448_s0 + $0x270] ss:$12 sps:$4 sm:$0xff]   ;;  %v3625_v0 = vld [vmem:[%s5448_s0 + $0x200] ss:$12 sps:$4 sm:$0xff]  }
  0x92   :  { %1711 = vmatprep.mubr.bf16.mxu0 %v3540_v1  ;;  %2095 = vmatprep.mubr.bf16.mxu1 %v3542_v2  ;;  %v3626_v1 = vld [vmem:[%s5448_s0 + $0x28c] ss:$12 sps:$4 sm:$0xff]  }
  0x93   :  { %v3628_v2 = vld [vmem:[%s5448_s0 + $0x218] ss:$12 sps:$4 sm:$0xff]  }
  0x99   :  { %1712 = vmatmul.mubr.bf16.gmra.mrb[44].mxu0 %v3544_v3  ;;  %2096 = vmatmul.mubr.bf16.gmra.mrb[44].mxu1 %v3545_v4 }
  0x9a   :  { %1719 = vmatprep.mubr.bf16.mxu0 %v3546_v5  ;;  %2103 = vmatprep.mubr.bf16.mxu1 %v3548_v6 }
  0xa1   :  { %1720 = vmatmul.mubr.bf16.gmra.mrb[48].mxu0 %v3550_v7  ;;  %2104 = vmatmul.mubr.bf16.gmra.mrb[48].mxu1 %v3551_v8  ;;  %v3629_v7 = vld [vmem:[%s5448_s0 + $0x288] ss:$12 sps:$4 sm:$0xff]   ;;  %v3630_v8 = vld [vmem:[%s5448_s0 + $0x230] ss:$12 sps:$4 sm:$0xff]  }
  0xa2   :  { %1727 = vmatprep.mubr.bf16.mxu0 %v3553_v9  ;;  %2111 = vmatprep.mubr.bf16.mxu1 %v3555_v10 }
  0xa9   :  { %1728 = vmatmul.mubr.bf16.gmra.mrb[52].mxu0 %v3557_v11  ;;  %2112 = vmatmul.mubr.bf16.gmra.mrb[52].mxu1 %v3558_v12  ;;  %v3631_v11 = vld [vmem:[%s5448_s0 + $0x2a4] ss:$12 sps:$4 sm:$0xff]   ;;  %v3633_v12 = vld [vmem:[%s5448_s0 + $0x248] ss:$12 sps:$4 sm:$0xff]  }
  0xaa   :  { %1735 = vmatprep.mubr.bf16.mxu0 %v3559_v13  ;;  %2119 = vmatprep.mubr.bf16.mxu1 %v3561_v14 }
  0xb1   :  { %1736 = vmatmul.mubr.bf16.gmra.mrb[56].mxu0 %v3563_v15  ;;  %2120 = vmatmul.mubr.bf16.gmra.mrb[56].mxu1 %v3564_v16 }
  0xb2   :  { %1743 = vmatprep.mubr.bf16.mxu0 %v3565_v17  ;;  %2127 = vmatprep.mubr.bf16.mxu1 %v3567_v18 }
  0xb9   :  { %1744 = vmatmul.mubr.bf16.gmra.mrb[60].mxu0 %v3569_v19  ;;  %2128 = vmatmul.mubr.bf16.gmra.mrb[60].mxu1 %v3570_v20  ;;  %v3634_v19 = vld [vmem:[%s5448_s0 + $0x2a0] ss:$12 sps:$4 sm:$0xff]  }
  0xba   :  { %1751 = vmatprep.mubr.bf16.mxu0 %v3571_v21  ;;  %3294 = vmatprep.mubr.msk.bf16.mxu1 %vm1398_vm0, %v3573_v22  ;;  %v3635_v20 = vld [vmem:[%s5448_s0 + $0x260] ss:$12 sps:$4 sm:$0xff]  }
  0xc1   :  { %1752 = vmatmul.mubr.bf16.gmra.mrb[64].mxu0 %v3574_v23  ;;  %3295 = vmatmul.mubr.msk.bf16.vlgmr.msra.gmra.mrb[64].mxu1 %vm1398_vm0, %v3575_v24  ;;  %v3636_v23 = vld [vmem:[%s5448_s0 + $0x2bc] ss:$12 sps:$4 sm:$0xff]   ;;  %v3638_v24 = vld [vmem:[%s5448_s0 + $0x278] ss:$12 sps:$4 sm:$0xff]  }
  0xc2   :  { %1759 = vmatprep.mubr.bf16.mxu0 %v3576_v25  ;;  %3298 = vmatprep.mubr.msk.bf16.mxu1 %vm1398_vm0, %v3578_v26 }
  0xc9   :  { %1760 = vmatmul.mubr.bf16.gmra.mrb[68].mxu0 %v3579_v27  ;;  %3299 = vmatmul.mubr.msk.bf16.gmra.mrb[68].mxu1 %vm1398_vm0, %v3580_v28 }
  0xca   :  { %1767 = vmatprep.mubr.bf16.mxu0 %v3581_v29  ;;  %3302 = vmatprep.mubr.msk.bf16.mxu1 %vm1398_vm0, %v3583_v30 }
  0xd1   :  { %1768 = vmatmul.mubr.bf16.gmra.mrb[72].mxu0 %v3584_v31  ;;  %3303 = vmatmul.mubr.msk.bf16.gmra.mrb[72].mxu1 %vm1398_vm0, %v3585_v32  ;;  %v3639_v31 = vld [vmem:[%s5448_s0 + $0x2b8] ss:$12 sps:$4 sm:$0xff]   ;;  %v3640_v32 = vld [vmem:[%s5448_s0 + $0x290] ss:$12 sps:$4 sm:$0xff]  }
  0xd2   :  { %1775 = vmatprep.mubr.bf16.mxu0 %v3586_v33  ;;  %3306 = vmatprep.mubr.msk.bf16.mxu1 %vm1398_vm0, %v3588_v34 }
  0xd9   :  { %1776 = vmatmul.mubr.bf16.gmra.mrb[76].mxu0 %v3589_v35  ;;  %3307 = vmatmul.mubr.msk.bf16.gmra.mrb[76].mxu1 %vm1398_vm0, %v3590_v36  ;;  %v3641_v35 = vld [vmem:[%s5448_s0 + $0x2d4] ss:$12 sps:$4 sm:$0xff]  }
  0xda   :  { %1783 = vmatprep.mubr.bf16.mxu0 %v3591_v37  ;;  %3310 = vmatprep.mubr.msk.bf16.mxu1 %vm1398_vm0, %v3593_v38  ;;  %v3643_v36 = vld [vmem:[%s5448_s0 + $0x2a8] ss:$12 sps:$4 sm:$0xff]  }
  0xe1   :  { %1784 = vmatmul.mubr.bf16.gmra.mrb[80].mxu0 %v3594_v39  ;;  %3311 = vmatmul.mubr.msk.bf16.gmra.mrb[80].mxu1 %vm1398_vm0, %v3595_v40 }
  0xe2   :  { %1791 = vmatprep.mubr.bf16.mxu0 %v3596_v41  ;;  %3314 = vmatprep.mubr.msk.bf16.mxu1 %vm1398_vm0, %v3598_v42 }
  0xe9   :  { %1792 = vmatmul.mubr.bf16.gmra.mrb[84].mxu0 %v3599_v43  ;;  %3315 = vmatmul.mubr.msk.bf16.gmra.mrb[84].mxu1 %vm1398_vm0, %v3600_v44  ;;  %v3644_v43 = vld [vmem:[%s5448_s0 + $0x2d0] ss:$12 sps:$4 sm:$0xff]   ;;  %v3645_v44 = vld [vmem:[%s5448_s0 + $0x2c0] ss:$12 sps:$4 sm:$0xff]  }
  0xea   :  { %1799 = vmatprep.mubr.bf16.mxu0 %v3601_v45  ;;  %3318 = vmatprep.mubr.msk.bf16.mxu1 %vm1398_vm0, %v3603_v46 }
  0xf1   :  { %1800 = vmatmul.mubr.bf16.gmra.mrb[88].mxu0 %v3604_v47  ;;  %3319 = vmatmul.mubr.msk.bf16.gmra.mrb[88].mxu1 %vm1398_vm0, %v3605_v48  ;;  %v3646_v47 = vld [vmem:[%s5448_s0 + $0x2ec] ss:$12 sps:$4 sm:$0xff]  }
  0xf2   :  { %1807 = vmatprep.mubr.bf16.mxu0 %v3606_v49  ;;  %3322 = vmatprep.mubr.msk.bf16.mxu1 %vm1398_vm0, %v3608_v50  ;;  %v3648_v48 = vld [vmem:[%s5448_s0 + $0x2d8] ss:$12 sps:$4 sm:$0xff]  }
  0xf9   :  { %1808 = vmatmul.mubr.bf16.gmra.mrb[92].mxu0 %v3609_v51  ;;  %3323 = vmatmul.mubr.msk.bf16.gmra.mrb[92].mxu1 %vm1398_vm0, %v3610_v52 }
  0xfa   :  { %1815 = vmatprep.mubr.bf16.mxu0 %v3611_v53  ;;  %3326 = vmatprep.mubr.msk.bf16.mxu1 %vm1398_vm0, %v3613_v54 }
 0x101   :  { %1816 = vmatmul.mubr.bf16.gmra.mrb[96].mxu0 %v3614_v55  ;;  %3327 = vmatmul.mubr.msk.bf16.gmra.mrb[96].mxu1 %vm1398_vm0, %v3615_v56  ;;  %v3649_v55 = vld [vmem:[%s5448_s0 + $0x2e8] ss:$12 sps:$4 sm:$0xff]   ;;  %v3650_v56 = vld [vmem:[%s5448_s0 + $0x2f0] ss:$12 sps:$4 sm:$0xff]  }
 0x102   :  { %1823 = vmatprep.mubr.bf16.mxu0 %v3616_v57  ;;  %3330 = vmatprep.mubr.msk.bf16.mxu1 %vm1398_vm0, %v3618_v58 }
 0x109   :  { %1824 = vmatmul.mubr.bf16.gmra.mrb[100].mxu0 %v3619_v59  ;;  %3331 = vmatmul.mubr.msk.bf16.gmra.mrb[100].mxu1 %vm1398_vm0, %v3620_v60  ;;  %v3651_v59 = vld [vmem:[%s5448_s0 + $0x304] ss:$12 sps:$4 sm:$0xff]   ;;  %v3653_v60 = vld [vmem:[%s5448_s0 + $0x308] ss:$12 sps:$4 sm:$0xff]  }
 0x10a   :  { %1831 = vmatprep.mubr.bf16.mxu0 %v3621_v61  ;;  %3334 = vmatprep.mubr.msk.bf16.mxu1 %vm1398_vm0, %v3623_v62 }
 0x111   :  { %1832 = vmatmul.mubr.bf16.gmra.mrb[104].mxu0 %v3624_v63  ;;  %3335 = vmatmul.mubr.msk.bf16.gmra.mrb[104].mxu1 %vm1398_vm0, %v3625_v0 }
 0x112   :  { %1839 = vmatprep.mubr.bf16.mxu0 %v3626_v1  ;;  %3338 = vmatprep.mubr.msk.bf16.mxu1 %vm1398_vm0, %v3628_v2 }
 0x114   :  { %v4198_v3 = vpop.f32.mrb[0].mxu0  ;;  %v4200_v4 = vpop.f32.mrb[0].mxu1 }
 0x115   :  { %v1627_v5 = vpop.f32.mrb[1].mxu0  ;;  %v2011_v6 = vpop.f32.mrb[1].mxu1 }
 0x116   :  { %v4208_v9 = vpop.f32.mrb[2].mxu0  ;;  %v4210_v10 = vpop.f32.mrb[2].mxu1  ;;  %v3654_v5 = vld [vmem:[%s5448_s0 + $0x300] ss:$12 sps:$4 sm:$0xff]  }
 0x117   :  { %v1630_v13 = vpop.f32.mrb[3].mxu0  ;;  %v2014_v14 = vpop.f32.mrb[3].mxu1  ;;  %v3655_v6 = vld [vmem:[%s5448_s0 + $0x320] ss:$12 sps:$4 sm:$0xff]  }
 0x119   :  { %1840 = vmatmul.mubr.bf16.gmra.mrb[108].mxu0 %v3629_v7  ;;  %3339 = vmatmul.mubr.msk.bf16.gmra.mrb[108].mxu1 %vm1398_vm0, %v3630_v8 }
 0x11a   :  { %1847 = vmatprep.mubr.bf16.mxu0 %v3631_v11  ;;  %3342 = vmatprep.mubr.msk.bf16.mxu1 %vm1398_vm0, %v3633_v12  ;;  %v3656_v11 = vld [vmem:[%s5448_s0 + $0x31c] ss:$12 sps:$4 sm:$0xff]   ;;  %v3658_v12 = vld [vmem:[%s5448_s0 + $0x338] ss:$12 sps:$4 sm:$0xff]  }
 0x11c   :  { %v4220_v15 = vpop.f32.mrb[4].mxu0  ;;  %v4222_v16 = vpop.f32.mrb[4].mxu1 }
 0x11d   :  { %v1635_v17 = vpop.f32.mrb[5].mxu0  ;;  %v2019_v18 = vpop.f32.mrb[5].mxu1 }
 0x11e   :  { %v4230_v21 = vpop.f32.mrb[6].mxu0  ;;  %v4232_v22 = vpop.f32.mrb[6].mxu1 }
 0x11f   :  { %v1638_v25 = vpop.f32.mrb[7].mxu0  ;;  %v2022_v26 = vpop.f32.mrb[7].mxu1 }
 0x121   :  { %1848 = vmatmul.mubr.bf16.gmra.mrb[112].mxu0 %v3634_v19  ;;  %3343 = vmatmul.mubr.msk.bf16.gmra.mrb[112].mxu1 %vm1398_vm0, %v3635_v20 }
 0x122   :  { %1855 = vmatprep.mubr.bf16.mxu0 %v3636_v23  ;;  %3346 = vmatprep.mubr.msk.bf16.mxu1 %vm1398_vm0, %v3638_v24  ;;  %v3659_v23 = vld [vmem:[%s5448_s0 + $0x318] ss:$12 sps:$4 sm:$0xff]   ;;  %v3660_v24 = vld [vmem:[%s5448_s0 + $0x350] ss:$12 sps:$4 sm:$0xff]  }
 0x124   :  { %v4242_v27 = vpop.f32.mrb[8].mxu0  ;;  %v4244_v28 = vpop.f32.mrb[8].mxu1 }
 0x125   :  { %v1643_v29 = vpop.f32.mrb[9].mxu0  ;;  %v2027_v30 = vpop.f32.mrb[9].mxu1 }
 0x126   :  { %v4252_v33 = vpop.f32.mrb[10].mxu0  ;;  %v4254_v34 = vpop.f32.mrb[10].mxu1  ;;  %v3661_v29 = vld [vmem:[%s5448_s0 + $0x334] ss:$12 sps:$4 sm:$0xff]  }
 0x127   :  { %v1646_v37 = vpop.f32.mrb[11].mxu0  ;;  %v2030_v38 = vpop.f32.mrb[11].mxu1  ;;  %v3663_v30 = vld [vmem:[%s5448_s0 + $0x368] ss:$12 sps:$4 sm:$0xff]  }
 0x129   :  { %1856 = vmatmul.mubr.bf16.gmra.mrb[116].mxu0 %v3639_v31  ;;  %3347 = vmatmul.mubr.msk.bf16.gmra.mrb[116].mxu1 %vm1398_vm0, %v3640_v32 }
 0x12a   :  { %1863 = vmatprep.mubr.bf16.mxu0 %v3641_v35  ;;  %3350 = vmatprep.mubr.msk.bf16.mxu1 %vm1398_vm0, %v3643_v36 }
 0x12c   :  { %v4264_v39 = vpop.f32.mrb[12].mxu0  ;;  %v4266_v40 = vpop.f32.mrb[12].mxu1 }
 0x12d   :  { %v1651_v41 = vpop.f32.mrb[13].mxu0  ;;  %v2035_v42 = vpop.f32.mrb[13].mxu1 }
 0x12e   :  { %v4274_v45 = vpop.f32.mrb[14].mxu0  ;;  %v4276_v46 = vpop.f32.mrb[14].mxu1  ;;  %v3664_v41 = vld [vmem:[%s5448_s0 + $0x330] ss:$12 sps:$4 sm:$0xff]   ;;  %v3665_v42 = vld [vmem:[%s5448_s0 + $0x380] ss:$12 sps:$4 sm:$0xff]  }
 0x12f   :  { %v1654_v49 = vpop.f32.mrb[15].mxu0  ;;  %v2038_v50 = vpop.f32.mrb[15].mxu1 }
 0x131   :  { %1864 = vmatmul.mubr.bf16.gmra.mrb[120].mxu0 %v3644_v43  ;;  %3351 = vmatmul.mubr.msk.bf16.gmra.mrb[120].mxu1 %vm1398_vm0, %v3645_v44 }
 0x132   :  { %1871 = vmatprep.mubr.bf16.mxu0 %v3646_v47  ;;  %3354 = vmatprep.mubr.msk.bf16.mxu1 %vm1398_vm0, %v3648_v48  ;;  %v3666_v47 = vld [vmem:[%s5448_s0 + $0x34c] ss:$12 sps:$4 sm:$0xff]  }
 0x133   :  { %v3668_v48 = vld [vmem:[%s5448_s0 + $0x398] ss:$12 sps:$4 sm:$0xff]  }
 0x134   :  { %v4286_v51 = vpop.f32.mrb[16].mxu0  ;;  %v4288_v52 = vpop.f32.mrb[16].mxu1 }
 0x135   :  { %v1659_v53 = vpop.f32.mrb[17].mxu0  ;;  %v2043_v54 = vpop.f32.mrb[17].mxu1 }
 0x136   :  { %v4296_v57 = vpop.f32.mrb[18].mxu0  ;;  %v4298_v58 = vpop.f32.mrb[18].mxu1 }
 0x137   :  { %v1662_v61 = vpop.f32.mrb[19].mxu0  ;;  %v2046_v62 = vpop.f32.mrb[19].mxu1 }
 0x139   :  { %1872 = vmatmul.mubr.bf16.gmra.mrb[124].mxu0 %v3649_v55  ;;  %3355 = vmatmul.mubr.msk.bf16.gmra.mrb[124].mxu1 %vm1398_vm0, %v3650_v56 }
 0x13a   :  { %1879 = vmatprep.mubr.bf16.mxu0 %v3651_v59  ;;  %3358 = vmatprep.mubr.msk.bf16.mxu1 %vm1398_vm0, %v3653_v60  ;;  %v3669_v59 = vld [vmem:[%s5448_s0 + $0x348] ss:$12 sps:$4 sm:$0xff]   ;;  %v3670_v60 = vld [vmem:[%s5448_s0 + $0x3b0] ss:$12 sps:$4 sm:$0xff]  }
 0x13c   :  { %v4308_v63 = vpop.f32.mrb[20].mxu0  ;;  %v4310_v0 = vpop.f32.mrb[20].mxu1 }
 0x13d   :  { %v1667_v1 = vpop.f32.mrb[21].mxu0  ;;  %v2051_v2 = vpop.f32.mrb[21].mxu1 }
 0x13e   :  { %v4318_v7 = vpop.f32.mrb[22].mxu0  ;;  %v4320_v8 = vpop.f32.mrb[22].mxu1  ;;  %v3671_v1 = vld [vmem:[%s5448_s0 + $0x364] ss:$12 sps:$4 sm:$0xff]   ;;  %v3673_v2 = vld [vmem:[%s5448_s0 + $0x3c8] ss:$12 sps:$4 sm:$0xff]  }
 0x13f   :  { %v1670_v13 = vpop.f32.mrb[23].mxu0  ;;  %v2054_v14 = vpop.f32.mrb[23].mxu1 }
 0x141   :  { %1880 = vmatmul.mubr.bf16.gmra.mrb[128].mxu0 %v3654_v5  ;;  %3359 = vmatmul.mubr.msk.bf16.gmra.mrb[128].mxu1 %vm1398_vm0, %v3655_v6 }
 0x142   :  { %1887 = vmatprep.mubr.bf16.mxu0 %v3656_v11  ;;  %3362 = vmatprep.mubr.msk.bf16.mxu1 %vm1398_vm0, %v3658_v12 }
 0x144   :  { %v4330_v17 = vpop.f32.mrb[24].mxu0  ;;  %v4332_v18 = vpop.f32.mrb[24].mxu1 }
 0x145   :  { %v1675_v19 = vpop.f32.mrb[25].mxu0  ;;  %v2059_v20 = vpop.f32.mrb[25].mxu1 }
 0x146   :  { %v4340_v25 = vpop.f32.mrb[26].mxu0  ;;  %v4342_v26 = vpop.f32.mrb[26].mxu1  ;;  %v3674_v19 = vld [vmem:[%s5448_s0 + $0x360] ss:$12 sps:$4 sm:$0xff]  }
 0x147   :  { %5451 = vst [vmem:[#allocation2_spill] sm:$0xff] %v4342_v26  ;;  %v1678_v31 = vpop.f32.mrb[27].mxu0  ;;  %v2062_v32 = vpop.f32.mrb[27].mxu1  ;;  %v3675_v20 = vld [vmem:[%s5448_s0 + $0x3e0] ss:$12 sps:$4 sm:$0xff]  }
 0x149   :  { %1888 = vmatmul.mubr.bf16.gmra.mrb[132].mxu0 %v3659_v23  ;;  %3363 = vmatmul.mubr.msk.bf16.gmra.mrb[132].mxu1 %vm1398_vm0, %v3660_v24 }
 0x14a   :  { %1895 = vmatprep.mubr.bf16.mxu0 %v3661_v29  ;;  %3366 = vmatprep.mubr.msk.bf16.mxu1 %vm1398_vm0, %v3663_v30  ;;  %v3676_v29 = vld [vmem:[%s5448_s0 + $0x37c] ss:$12 sps:$4 sm:$0xff]   ;;  %v3678_v30 = vld [vmem:[%s5448_s0 + $0x3f8] ss:$12 sps:$4 sm:$0xff]  }
 0x14c   :  { %v4352_v35 = vpop.f32.mrb[28].mxu0  ;;  %v4354_v36 = vpop.f32.mrb[28].mxu1 }
 0x14d   :  { %v1683_v37 = vpop.f32.mrb[29].mxu0  ;;  %v2067_v38 = vpop.f32.mrb[29].mxu1 }
 0x14e   :  { %v4362_v43 = vpop.f32.mrb[30].mxu0  ;;  %v4364_v44 = vpop.f32.mrb[30].mxu1 }
 0x14f   :  { %v1686_v49 = vpop.f32.mrb[31].mxu0  ;;  %v2070_v50 = vpop.f32.mrb[31].mxu1 }
 0x151   :  { %1896 = vmatmul.mubr.bf16.gmra.mrb[136].mxu0 %v3664_v41  ;;  %3367 = vmatmul.mubr.msk.bf16.gmra.mrb[136].mxu1 %vm1398_vm0, %v3665_v42 }
 0x152   :  { %1903 = vmatprep.mubr.bf16.mxu0 %v3666_v47  ;;  %3370 = vmatprep.mubr.msk.bf16.mxu1 %vm1398_vm0, %v3668_v48  ;;  %v3679_v47 = vld [vmem:[%s5448_s0 + $0x378] ss:$12 sps:$4 sm:$0xff]   ;;  %v3680_v48 = vld [vmem:[%s5448_s0 + $0x410] ss:$12 sps:$4 sm:$0xff]  }
 0x154   :  { %v4374_v53 = vpop.f32.mrb[32].mxu0  ;;  %v4376_v54 = vpop.f32.mrb[32].mxu1 }
 0x155   :  { %5452 = vst [vmem:[#allocation3_spill] sm:$0xff] %v4376_v54  ;;  %v1691_v55 = vpop.f32.mrb[33].mxu0  ;;  %v2075_v56 = vpop.f32.mrb[33].mxu1 }
 0x156   :  { %v4384_v61 = vpop.f32.mrb[34].mxu0  ;;  %v4386_v62 = vpop.f32.mrb[34].mxu1  ;;  %v3681_v55 = vld [vmem:[%s5448_s0 + $0x394] ss:$12 sps:$4 sm:$0xff]  }
 0x157   :  { %5453 = vst [vmem:[#allocation4_spill] sm:$0xff] %v4386_v62  ;;  %v1694_v5 = vpop.f32.mrb[35].mxu0  ;;  %v2078_v6 = vpop.f32.mrb[35].mxu1  ;;  %v3683_v56 = vld [vmem:[%s5448_s0 + $0x428] ss:$12 sps:$4 sm:$0xff]  }
 0x159   :  { %1904 = vmatmul.mubr.bf16.gmra.mrb[140].mxu0 %v3669_v59  ;;  %3371 = vmatmul.mubr.msk.bf16.gmra.mrb[140].mxu1 %vm1398_vm0, %v3670_v60 }
 0x15a   :  { %1911 = vmatprep.mubr.bf16.mxu0 %v3671_v1  ;;  %3374 = vmatprep.mubr.msk.bf16.mxu1 %vm1398_vm0, %v3673_v2 }
 0x15c   :  { %v4396_v11 = vpop.f32.mrb[36].mxu0  ;;  %v4398_v12 = vpop.f32.mrb[36].mxu1 }
 0x15d   :  { %5454 = vst [vmem:[#allocation5_spill] sm:$0xff] %v4398_v12  ;;  %v1699_v13 = vpop.f32.mrb[37].mxu0  ;;  %v2083_v14 = vpop.f32.mrb[37].mxu1 }
 0x15e   :  { %v4406_v23 = vpop.f32.mrb[38].mxu0  ;;  %v4408_v24 = vpop.f32.mrb[38].mxu1  ;;  %v3684_v13 = vld [vmem:[%s5448_s0 + $0x390] ss:$12 sps:$4 sm:$0xff]   ;;  %v3685_v14 = vld [vmem:[%s5448_s0 + $0x440] ss:$12 sps:$4 sm:$0xff]  }
 0x15f   :  { %5455 = vst [vmem:[#allocation6_spill] sm:$0xff] %v4408_v24  ;;  %v1702_v31 = vpop.f32.mrb[39].mxu0  ;;  %v2086_v32 = vpop.f32.mrb[39].mxu1 }
 0x161   :  { %1912 = vmatmul.mubr.bf16.gmra.mrb[144].mxu0 %v3674_v19  ;;  %3375 = vmatmul.mubr.msk.bf16.gmra.mrb[144].mxu1 %vm1398_vm0, %v3675_v20 }
 0x162   :  { %1919 = vmatprep.mubr.bf16.mxu0 %v3676_v29  ;;  %3378 = vmatprep.mubr.msk.bf16.mxu1 %vm1398_vm0, %v3678_v30  ;;  %v3686_v29 = vld [vmem:[%s5448_s0 + $0x3ac] ss:$12 sps:$4 sm:$0xff]  }
 0x163   :  { %v3688_v30 = vld [vmem:[%s5448_s0 + $0x458] ss:$12 sps:$4 sm:$0xff]  }
 0x164   :  { %v4418_v37 = vpop.f32.mrb[40].mxu0  ;;  %v4420_v38 = vpop.f32.mrb[40].mxu1 }
 0x165   :  { %5456 = vst [vmem:[#allocation7_spill] sm:$0xff] %v4420_v38  ;;  %v1707_v41 = vpop.f32.mrb[41].mxu0  ;;  %v2091_v42 = vpop.f32.mrb[41].mxu1 }
 0x166   :  { %v4428_v49 = vpop.f32.mrb[42].mxu0  ;;  %v4430_v50 = vpop.f32.mrb[42].mxu1 }
 0x167   :  { %5457 = vst [vmem:[#allocation8_spill] sm:$0xff] %v4430_v50  ;;  %v1710_v59 = vpop.f32.mrb[43].mxu0  ;;  %v2094_v60 = vpop.f32.mrb[43].mxu1  ;;  %v3704_v50 = vld [vmem:[%s5448_s0 + $0x3f0] ss:$12 sps:$4 sm:$0xff]  }
 0x169   :  { %1920 = vmatmul.mubr.bf16.gmra.mrb[148].mxu0 %v3679_v47  ;;  %3379 = vmatmul.mubr.msk.bf16.gmra.mrb[148].mxu1 %vm1398_vm0, %v3680_v48 }
 0x16a   :  { %1927 = vmatprep.mubr.bf16.mxu0 %v3681_v55  ;;  %3382 = vmatprep.mubr.msk.bf16.mxu1 %vm1398_vm0, %v3683_v56  ;;  %v3689_v55 = vld [vmem:[%s5448_s0 + $0x3a8] ss:$12 sps:$4 sm:$0xff]   ;;  %v3690_v56 = vld [vmem:[%s5448_s0 + $0x470] ss:$12 sps:$4 sm:$0xff]  }
 0x16c   :  { %v4440_v1 = vpop.f32.mrb[44].mxu0  ;;  %v4442_v2 = vpop.f32.mrb[44].mxu1 }
 0x16d   :  { %5458 = vst [vmem:[#allocation9_spill] sm:$0xff] %v4442_v2  ;;  %v1715_v5 = vpop.f32.mrb[45].mxu0  ;;  %v2099_v6 = vpop.f32.mrb[45].mxu1 }
 0x16e   :  { %v4450_v19 = vpop.f32.mrb[46].mxu0  ;;  %v4452_v20 = vpop.f32.mrb[46].mxu1  ;;  %v3691_v5 = vld [vmem:[%s5448_s0 + $0x3c4] ss:$12 sps:$4 sm:$0xff]   ;;  %v3693_v6 = vld [vmem:[%s5448_s0 + $0x488] ss:$12 sps:$4 sm:$0xff]  }
 0x16f   :  { %5459 = vst [vmem:[#allocation10_spill] sm:$0xff] %v4452_v20  ;;  %v1718_v31 = vpop.f32.mrb[47].mxu0  ;;  %v2102_v32 = vpop.f32.mrb[47].mxu1 }
 0x171   :  { %1928 = vmatmul.mubr.bf16.gmra.mrb[152].mxu0 %v3684_v13  ;;  %3383 = vmatmul.mubr.msk.bf16.gmra.mrb[152].mxu1 %vm1398_vm0, %v3685_v14 }
 0x172   :  { %1935 = vmatprep.mubr.bf16.mxu0 %v3686_v29  ;;  %3386 = vmatprep.mubr.msk.bf16.mxu1 %vm1398_vm0, %v3688_v30 }
 0x174   :  { %v4462_v41 = vpop.f32.mrb[48].mxu0  ;;  %v4464_v42 = vpop.f32.mrb[48].mxu1 }
 0x175   :  { %5460 = vst [vmem:[#allocation11_spill] sm:$0xff] %v4464_v42  ;;  %v1723_v47 = vpop.f32.mrb[49].mxu0  ;;  %v2107_v48 = vpop.f32.mrb[49].mxu1  ;;  %v3699_v42 = vld [vmem:[%s5448_s0 + $0x3d8] ss:$12 sps:$4 sm:$0xff]  }
 0x176   :  { %v4472_v59 = vpop.f32.mrb[50].mxu0  ;;  %v4474_v60 = vpop.f32.mrb[50].mxu1  ;;  %v3694_v47 = vld [vmem:[%s5448_s0 + $0x3c0] ss:$12 sps:$4 sm:$0xff]  }
 0x177   :  { %5461 = vst [vmem:[#allocation12_spill] sm:$0xff] %v4474_v60  ;;  %v1726_v13 = vpop.f32.mrb[51].mxu0  ;;  %v2110_v14 = vpop.f32.mrb[51].mxu1  ;;  %v3695_v48 = vld [vmem:[%s5448_s0 + $0x4a0] ss:$12 sps:$4 sm:$0xff]  }
 0x179   :  { %1936 = vmatmul.mubr.bf16.gmra.mrb[156].mxu0 %v3689_v55  ;;  %3387 = vmatmul.mubr.msk.bf16.gmra.mrb[156].mxu1 %vm1398_vm0, %v3690_v56 }
 0x17a   :  { %1943 = vmatprep.mubr.bf16.mxu0 %v3691_v5  ;;  %3390 = vmatprep.mubr.msk.bf16.mxu1 %vm1398_vm0, %v3693_v6  ;;  %v3696_v5 = vld [vmem:[%s5448_s0 + $0x3dc] ss:$12 sps:$4 sm:$0xff]   ;;  %v3698_v6 = vld [vmem:[%s5448_s0 + $0x4b8] ss:$12 sps:$4 sm:$0xff]  }
 0x17c   :  { %v4484_v29 = vpop.f32.mrb[52].mxu0  ;;  %v4486_v30 = vpop.f32.mrb[52].mxu1 }
 0x17d   :  { %5462 = vst [vmem:[#allocation13_spill] sm:$0xff] %v4486_v30  ;;  %v1731_v31 = vpop.f32.mrb[53].mxu0  ;;  %v2115_v32 = vpop.f32.mrb[53].mxu1 }
 0x17e   :  { %v4494_v55 = vpop.f32.mrb[54].mxu0  ;;  %v4496_v56 = vpop.f32.mrb[54].mxu1 }
 0x17f   :  { %5463 = vst [vmem:[#allocation14_spill] sm:$0xff] %v4496_v56  ;;  %v1734_v13 = vpop.f32.mrb[55].mxu0  ;;  %v2118_v14 = vpop.f32.mrb[55].mxu1 }
 0x180   :  { %v3700_v13 = vld [vmem:[%s5448_s0 + $0x4d0] ss:$12 sps:$4 sm:$0xff]  }
 0x181   :  { %1944 = vmatmul.mubr.bf16.gmra.mrb[160].mxu0 %v3694_v47  ;;  %3391 = vmatmul.mubr.msk.bf16.gmra.mrb[160].mxu1 %vm1398_vm0, %v3695_v48 }
 0x182   :  { %1951 = vmatprep.mubr.bf16.mxu0 %v3696_v5  ;;  %3394 = vmatprep.mubr.msk.bf16.mxu1 %vm1398_vm0, %v3698_v6  ;;  %v3701_v5 = vld [vmem:[%s5448_s0 + $0x3f4] ss:$12 sps:$4 sm:$0xff]  }
 0x184   :  { %v4506_v31 = vpop.f32.mrb[56].mxu0  ;;  %v4508_v32 = vpop.f32.mrb[56].mxu1 }
 0x185   :  { %5464 = vst [vmem:[#allocation15_spill] sm:$0xff] %v4508_v32  ;;  %v1739_v60 = vpop.f32.mrb[57].mxu0  ;;  %v2123_v56 = vpop.f32.mrb[57].mxu1 }
 0x186   :  { %v4516_v47 = vpop.f32.mrb[58].mxu0  ;;  %v4518_v48 = vpop.f32.mrb[58].mxu1  ;;  %v3703_v60 = vld [vmem:[%s5448_s0 + $0x4e8] ss:$12 sps:$4 sm:$0xff]  }
 0x187   :  { %5465 = vst [vmem:[#allocation16_spill] sm:$0xff] %v4518_v48  ;;  %v1742_v56 = vpop.f32.mrb[59].mxu0  ;;  %v2126_v6 = vpop.f32.mrb[59].mxu1 }
 0x188   :  { %v3705_v56 = vld [vmem:[%s5448_s0 + $0x500] ss:$12 sps:$4 sm:$0xff]  }
 0x189   :  { %1952 = vmatmul.mubr.bf16.gmra.mrb[164].mxu0 %v3699_v42  ;;  %3395 = vmatmul.mubr.msk.bf16.gmra.mrb[164].mxu1 %vm1398_vm0, %v3700_v13  ;;  %v4551_v6 = vld [vmem:[%s5449_s2] ss:$0 sm:$0xff] }
 0x18a   :  { %1959 = vmatprep.mubr.bf16.mxu0 %v3701_v5  ;;  %3398 = vmatprep.mubr.msk.bf16.mxu1 %vm1398_vm0, %v3703_v60  ;;  %v3706_v5 = vld [vmem:[%s5448_s0 + $0x40c] ss:$12 sps:$4 sm:$0xff]  }
 0x18c   :  { %v4528_v14 = vpop.f32.mrb[60].mxu0  ;;  %v4530_v32 = vpop.f32.mrb[60].mxu1 }
 0x18d   :  { %5466 = vst [vmem:[#allocation17_spill] sm:$0xff] %v4530_v32  ;;  %v1747_v48 = vpop.f32.mrb[61].mxu0  ;;  %v2131_v30 = vpop.f32.mrb[61].mxu1  ;;  %v1626_v32 = vadd.f32 %v4551_v6, %v4198_v3  ;;  %v1629_v3 = vadd.f32 %v4551_v6, %v4208_v9 }
 0x18e   :  { %v4538_v42 = vpop.f32.mrb[62].mxu0  ;;  %v4540_v13 = vpop.f32.mrb[62].mxu1  ;;  %v3708_v30 = vld [vmem:[%s5448_s0 + $0x518] ss:$12 sps:$4 sm:$0xff]  }
 0x18f   :  { %5467 = vst [vmem:[#allocation18_spill] sm:$0xff] %v4540_v13  ;;  %v1750_v48 = vpop.f32.mrb[63].mxu0  ;;  %v2134_v60 = vpop.f32.mrb[63].mxu1  ;;  %v1634_v13 = vadd.f32 %v4551_v6, %v4220_v15  ;;  %v3710_v15 = vld [vmem:[%s5448_s0 + $0x530] ss:$12 sps:$4 sm:$0xff]  }
 0x190   :  { %v1637_v60 = vadd.f32 %v4551_v6, %v4230_v21  ;;  %v3711_v21 = vld [vmem:[%s5448_s0 + $0x424] ss:$12 sps:$4 sm:$0xff]  }
 0x191   :  { %1960 = vmatmul.mubr.bf16.gmra.mrb[168].mxu0 %v3704_v50  ;;  %3399 = vmatmul.mubr.msk.bf16.gmra.mrb[168].mxu1 %vm1398_vm0, %v3705_v56  ;;  %v3709_v56 = vld [vmem:[%s5448_s0 + $0x408] ss:$12 sps:$4 sm:$0xff]  }
 0x192   :  { %1967 = vmatprep.mubr.bf16.mxu0 %v3706_v5  ;;  %3402 = vmatprep.mubr.msk.bf16.mxu1 %vm1398_vm0, %v3708_v30 }
 0x194   :  { %v4559_v20 = vpop.f32.mrb[64].mxu0  ;;  %v3296_v48 = vpop.f32.mrb[64].mxu1 }
 0x195   :  { %v2179_v38 = vadd.f32 %v3296_v48, %v1634_v13  ;;  %v1755_v2 = vpop.f32.mrb[65].mxu0  ;;  %v2170_v50 = vpop.f32.mrb[65].mxu1 }
 0x196   :  { %v2171_v5 = vadd.f32 %v2170_v50, %v1626_v32  ;;  %v4571_v30 = vpop.f32.mrb[66].mxu0  ;;  %v3297_v62 = vpop.f32.mrb[66].mxu1  ;;  %v3713_v2 = vld [vmem:[%s5448_s0 + $0x548] ss:$12 sps:$4 sm:$0xff]   ;;  %v3714_v50 = vld [vmem:[%s5448_s0 + $0x420] ss:$12 sps:$4 sm:$0xff]  }
 0x197   :  { %v2683_v13 = vmax.f32 %v2179_v38, 0.0  ;;  %v2182_v48 = vadd.f32 %v3297_v62, %v1637_v60  ;;  %v1758_v24 = vpop.f32.mrb[67].mxu0  ;;  %v2173_v54 = vpop.f32.mrb[67].mxu1  ;;  %v1642_v62 = vadd.f32 %v4551_v6, %v4242_v27  ;;  %v3715_v27 = vld [vmem:[%s5448_s0 + $0x560] ss:$12 sps:$4 sm:$0xff]  }
 0x198   :  { %v2681_v12 = vmax.f32 %v2171_v5, 0.0  ;;  %v2174_v26 = vadd.f32 %v2173_v54, %v1629_v3  ;;  %v1650_v54 = vadd.f32 %v4551_v6, %v4264_v39  ;;  %v1653_v24 = vadd.f32 %v4551_v6, %v4274_v45  ;;  %v3716_v45 = vld [vmem:[%s5448_s0 + $0x43c] ss:$12 sps:$4 sm:$0xff]  }
 0x199   :  { %2811 = vst.msk [vmem:[%s5450_s3 + $0x10] sm:$0xff] %vm1398_vm0, %v2683_v13  ;;  %v2684_v9 = vmax.f32 %v2182_v48, 0.0  ;;  %1968 = vmatmul.mubr.bf16.gmra.mrb[172].mxu0 %v3709_v56  ;;  %3403 = vmatmul.mubr.msk.bf16.gmra.mrb[172].mxu1 %vm1398_vm0, %v3710_v15  ;;  %v1645_v56 = vadd.f32 %v4551_v6, %v4252_v33 }
 0x19a   :  { %2809 = vst.msk [vmem:[%s5450_s3] sm:$0xff] %vm1398_vm0, %v2681_v12  ;;  %v2682_v38 = vmax.f32 %v2174_v26, 0.0  ;;  %1975 = vmatprep.mubr.bf16.mxu0 %v3711_v21  ;;  %3406 = vmatprep.mubr.msk.bf16.mxu1 %vm1398_vm0, %v3713_v2  ;;  %v3718_v21 = vld [vmem:[%s5448_s0 + $0x578] ss:$12 sps:$4 sm:$0xff]  }
 0x19b   :  { %2812 = vst.msk [vmem:[%s5450_s3 + $0x18] sm:$0xff] %vm1398_vm0, %v2684_v9 }
 0x19c   :  { %2810 = vst.msk [vmem:[%s5450_s3 + $0x8] sm:$0xff] %vm1398_vm0, %v2682_v38  ;;  %v4601_v26 = vpop.f32.mrb[68].mxu0  ;;  %v3300_v12 = vpop.f32.mrb[68].mxu1 }
 0x19d   :  { %v2195_v39 = vadd.f32 %v3300_v12, %v1650_v54  ;;  %v1763_v32 = vpop.f32.mrb[69].mxu0  ;;  %v2186_v60 = vpop.f32.mrb[69].mxu1  ;;  %v1666_v12 = vadd.f32 %v4551_v6, %v4308_v63 }
 0x19e   :  { %v2187_v15 = vadd.f32 %v2186_v60, %v1642_v62  ;;  %v4613_v3 = vpop.f32.mrb[70].mxu0  ;;  %v3301_v5 = vpop.f32.mrb[70].mxu1  ;;  %v1669_v60 = vadd.f32 %v4551_v6, %v4318_v7  ;;  %v3721_v7 = vld [vmem:[%s5448_s0 + $0x454] ss:$12 sps:$4 sm:$0xff]  }
 0x19f   :  { %v2687_v2 = vmax.f32 %v2195_v39, 0.0  ;;  %v2198_v13 = vadd.f32 %v3301_v5, %v1653_v24  ;;  %v1766_v48 = vpop.f32.mrb[71].mxu0  ;;  %v2189_v9 = vpop.f32.mrb[71].mxu1  ;;  %v1658_v24 = vadd.f32 %v4551_v6, %v4286_v51  ;;  %v3720_v51 = vld [vmem:[%s5448_s0 + $0x590] ss:$12 sps:$4 sm:$0xff]  }
 0x1a0   :  { %v2685_v38 = vmax.f32 %v2187_v15, 0.0  ;;  %v2190_v54 = vadd.f32 %v2189_v9, %v1645_v56  ;;  %v3719_v56 = vld [vmem:[%s5448_s0 + $0x438] ss:$12 sps:$4 sm:$0xff]   ;;  %v1661_v15 = vadd.f32 %v4551_v6, %v4296_v57 }
 0x1a1   :  { %2815 = vst.msk [vmem:[%s5450_s3 + $0x30] sm:$0xff] %vm1398_vm0, %v2687_v2  ;;  %v2688_v33 = vmax.f32 %v2198_v13, 0.0  ;;  %1976 = vmatmul.mubr.bf16.gmra.mrb[176].mxu0 %v3714_v50  ;;  %3407 = vmatmul.mubr.msk.bf16.gmra.mrb[176].mxu1 %vm1398_vm0, %v3715_v27  ;;  %v3723_v2 = vld [vmem:[%s5448_s0 + $0x5a8] ss:$12 sps:$4 sm:$0xff]  }
 0x1a2   :  { %2813 = vst.msk [vmem:[%s5450_s3 + $0x20] sm:$0xff] %vm1398_vm0, %v2685_v38  ;;  %v2686_v62 = vmax.f32 %v2190_v54, 0.0  ;;  %1983 = vmatprep.mubr.bf16.mxu0 %v3716_v45  ;;  %3410 = vmatprep.mubr.msk.bf16.mxu1 %vm1398_vm0, %v3718_v21 }
 0x1a3   :  { %2816 = vst.msk [vmem:[%s5450_s3 + $0x38] sm:$0xff] %vm1398_vm0, %v2688_v33 }
 0x1a4   :  { %2814 = vst.msk [vmem:[%s5450_s3 + $0x28] sm:$0xff] %vm1398_vm0, %v2686_v62  ;;  %v4643_v39 = vpop.f32.mrb[72].mxu0  ;;  %v3304_v32 = vpop.f32.mrb[72].mxu1 }
 0x1a5   :  { %v2211_v63 = vadd.f32 %v3304_v32, %v1666_v12  ;;  %v1771_v50 = vpop.f32.mrb[73].mxu0  ;;  %v2202_v27 = vpop.f32.mrb[73].mxu1  ;;  %v1682_v12 = vadd.f32 %v4551_v6, %v4352_v35 }
 0x1a6   :  { %v2203_v5 = vadd.f32 %v2202_v27, %v1658_v24  ;;  %v4655_v45 = vpop.f32.mrb[74].mxu0  ;;  %v3305_v21 = vpop.f32.mrb[74].mxu1  ;;  %v1674_v24 = vadd.f32 %v4551_v6, %v4330_v17  ;;  %v3725_v17 = vld [vmem:[%s5448_s0 + $0x5c0] ss:$12 sps:$4 sm:$0xff]  }
 0x1a7   :  { %v2691_v13 = vmax.f32 %v2211_v63, 0.0  ;;  %v2214_v48 = vadd.f32 %v3305_v21, %v1669_v60  ;;  %v1774_v9 = vpop.f32.mrb[75].mxu0  ;;  %v2205_v38 = vpop.f32.mrb[75].mxu1  ;;  %v1685_v63 = vadd.f32 %v4551_v6, %v4362_v43  ;;  %v3726_v43 = vld [vmem:[%s5448_s0 + $0x46c] ss:$12 sps:$4 sm:$0xff]  }
 0x1a8   :  { %v2689_v54 = vmax.f32 %v2203_v5, 0.0  ;;  %v2206_v33 = vadd.f32 %v2205_v38, %v1661_v15 }
 0x1a9   :  { %2819 = vst.msk [vmem:[%s5450_s3 + $0x50] sm:$0xff] %vm1398_vm0, %v2691_v13  ;;  %v2692_v57 = vmax.f32 %v2214_v48, 0.0  ;;  %1984 = vmatmul.mubr.bf16.gmra.mrb[180].mxu0 %v3719_v56  ;;  %3411 = vmatmul.mubr.msk.bf16.gmra.mrb[180].mxu1 %vm1398_vm0, %v3720_v51  ;;  %v3724_v56 = vld [vmem:[%s5448_s0 + $0x450] ss:$12 sps:$4 sm:$0xff]   ;;  %v1677_v51 = vadd.f32 %v4551_v6, %v4340_v25 }
 0x1aa   :  { %2817 = vst.msk [vmem:[%s5450_s3 + $0x40] sm:$0xff] %vm1398_vm0, %v2689_v54  ;;  %v2690_v62 = vmax.f32 %v2206_v33, 0.0  ;;  %1991 = vmatprep.mubr.bf16.mxu0 %v3721_v7  ;;  %3414 = vmatprep.mubr.msk.bf16.mxu1 %vm1398_vm0, %v3723_v2  ;;  %v3728_v7 = vld [vmem:[%s5448_s0 + $0x5d8] ss:$12 sps:$4 sm:$0xff]  }
 0x1ab   :  { %2820 = vst.msk [vmem:[%s5450_s3 + $0x58] sm:$0xff] %vm1398_vm0, %v2692_v57  ;;  %v1698_v57 = vadd.f32 %v4551_v6, %v4396_v11 }
 0x1ac   :  { %2818 = vst.msk [vmem:[%s5450_s3 + $0x48] sm:$0xff] %vm1398_vm0, %v2690_v62  ;;  %v4685_v32 = vpop.f32.mrb[76].mxu0  ;;  %v3308_v60 = vpop.f32.mrb[76].mxu1  ;;  %v1690_v62 = vadd.f32 %v4551_v6, %v4374_v53  ;;  %v3730_v53 = vld [vmem:[%s5448_s0 + $0x5f0] ss:$12 sps:$4 sm:$0xff]  }
 0x1ad   :  { %v2227_v35 = vadd.f32 %v3308_v60, %v1682_v12  ;;  %v1779_v50 = vpop.f32.mrb[77].mxu0  ;;  %v2218_v27 = vpop.f32.mrb[77].mxu1  ;;  %v1701_v60 = vadd.f32 %v4551_v6, %v4406_v23 }
 0x1ae   :  { %v2219_v15 = vadd.f32 %v2218_v27, %v1674_v24  ;;  %v4697_v5 = vpop.f32.mrb[78].mxu0  ;;  %v3309_v21 = vpop.f32.mrb[78].mxu1  ;;  %v3729_v50 = vld [vmem:[%s5448_s0 + $0x468] ss:$12 sps:$4 sm:$0xff]   ;;  %v1693_v27 = vadd.f32 %v4551_v6, %v4384_v61 }
 0x1af   :  { %v2695_v2 = vmax.f32 %v2227_v35, 0.0  ;;  %v2230_v13 = vadd.f32 %v3309_v21, %v1685_v63  ;;  %v1782_v48 = vpop.f32.mrb[79].mxu0  ;;  %v2221_v9 = vpop.f32.mrb[79].mxu1 }
 0x1b0   :  { %v2693_v38 = vmax.f32 %v2219_v15, 0.0  ;;  %v2222_v54 = vadd.f32 %v2221_v9, %v1677_v51  ;;  %v1714_v48 = vadd.f32 %v4551_v6, %v4440_v1  ;;  %v1706_v9 = vadd.f32 %v4551_v6, %v4418_v37 }
 0x1b1   :  { %2823 = vst.msk [vmem:[%s5450_s3 + $0x70] sm:$0xff] %vm1398_vm0, %v2695_v2  ;;  %v2696_v25 = vmax.f32 %v2230_v13, 0.0  ;;  %1992 = vmatmul.mubr.bf16.gmra.mrb[184].mxu0 %v3724_v56  ;;  %3415 = vmatmul.mubr.msk.bf16.gmra.mrb[184].mxu1 %vm1398_vm0, %v3725_v17 }
 0x1b2   :  { %2821 = vst.msk [vmem:[%s5450_s3 + $0x60] sm:$0xff] %vm1398_vm0, %v2693_v38  ;;  %v2694_v33 = vmax.f32 %v2222_v54, 0.0  ;;  %1999 = vmatprep.mubr.bf16.mxu0 %v3726_v43  ;;  %3418 = vmatprep.mubr.msk.bf16.mxu1 %vm1398_vm0, %v3728_v7 }
 0x1b3   :  { %2824 = vst.msk [vmem:[%s5450_s3 + $0x78] sm:$0xff] %vm1398_vm0, %v2696_v25  ;;  %v1717_v25 = vadd.f32 %v4551_v6, %v4450_v19 }
 0x1b4   :  { %2822 = vst.msk [vmem:[%s5450_s3 + $0x68] sm:$0xff] %vm1398_vm0, %v2694_v33  ;;  %v4727_v12 = vpop.f32.mrb[80].mxu0  ;;  %v3312_v24 = vpop.f32.mrb[80].mxu1 }
 0x1b5   :  { %v2243_v11 = vadd.f32 %v3312_v24, %v1698_v57  ;;  %v1787_v63 = vpop.f32.mrb[81].mxu0  ;;  %v2234_v35 = vpop.f32.mrb[81].mxu1 }
 0x1b6   :  { %v2235_v56 = vadd.f32 %v2234_v35, %v1690_v62  ;;  %v4739_v17 = vpop.f32.mrb[82].mxu0  ;;  %v3313_v51 = vpop.f32.mrb[82].mxu1  ;;  %v1709_v62 = vadd.f32 %v4551_v6, %v4428_v49 }
 0x1b7   :  { %v2699_v15 = vmax.f32 %v2243_v11, 0.0  ;;  %v2246_v23 = vadd.f32 %v3313_v51, %v1701_v60  ;;  %v1790_v21 = vpop.f32.mrb[83].mxu0  ;;  %v2237_v43 = vpop.f32.mrb[83].mxu1  ;;  %v1722_v51 = vadd.f32 %v4551_v6, %v4462_v41 }
 0x1b8   :  { %v2697_v7 = vmax.f32 %v2235_v56, 0.0  ;;  %v2238_v2 = vadd.f32 %v2237_v43, %v1693_v27  ;;  %v1730_v56 = vadd.f32 %v4551_v6, %v4484_v29  ;;  %v1733_v21 = vadd.f32 %v4551_v6, %v4494_v55 }
 0x1b9   :  { %2827 = vst.msk [vmem:[%s5450_s3 + $0x90] sm:$0xff] %vm1398_vm0, %v2699_v15  ;;  %v2700_v13 = vmax.f32 %v2246_v23, 0.0  ;;  %2000 = vmatmul.mubr.bf16.gmra.mrb[188].mxu0 %v3729_v50  ;;  %3419 = vmatmul.mubr.msk.bf16.gmra.mrb[188].mxu1 %vm1398_vm0, %v3730_v53 }
 0x1ba   :  { %2825 = vst.msk [vmem:[%s5450_s3 + $0x80] sm:$0xff] %vm1398_vm0, %v2697_v7  ;;  %v2698_v61 = vmax.f32 %v2238_v2, 0.0  ;;  %v1725_v2 = vadd.f32 %v4551_v6, %v4472_v59 }
 0x1bb   :  { %2828 = vst.msk [vmem:[%s5450_s3 + $0x98] sm:$0xff] %vm1398_vm0, %v2700_v13 }
 0x1bc   :  { %2826 = vst.msk [vmem:[%s5450_s3 + $0x88] sm:$0xff] %vm1398_vm0, %v2698_v61  ;;  %v4762_v38 = vpop.f32.mrb[84].mxu0  ;;  %v3316_v54 = vpop.f32.mrb[84].mxu1 }
 0x1bd   :  { %v2259_v1 = vadd.f32 %v3316_v54, %v1714_v48  ;;  %v1795_v33 = vpop.f32.mrb[85].mxu0  ;;  %v2250_v57 = vpop.f32.mrb[85].mxu1 }
 0x1be   :  { %v2251_v24 = vadd.f32 %v2250_v57, %v1706_v9  ;;  %v4768_v60 = vpop.f32.mrb[86].mxu0  ;;  %v3317_v37 = vpop.f32.mrb[86].mxu1  ;;  %v1746_v57 = vadd.f32 %v4551_v6, %v4528_v14 }
 0x1bf   :  { %v2703_v11 = vmax.f32 %v2259_v1, 0.0  ;;  %v2262_v63 = vadd.f32 %v3317_v37, %v1717_v25  ;;  %v1798_v35 = vpop.f32.mrb[87].mxu0  ;;  %v2253_v50 = vpop.f32.mrb[87].mxu1 }
 0x1c0   :  { %v2701_v53 = vmax.f32 %v2251_v24, 0.0  ;;  %v2254_v27 = vadd.f32 %v2253_v50, %v1709_v62  ;;  %v1738_v62 = vadd.f32 %v4551_v6, %v4506_v31  ;;  %v1741_v50 = vadd.f32 %v4551_v6, %v4516_v47 }
 0x1c1   :  { %2831 = vst.msk [vmem:[%s5450_s3 + $0xb0] sm:$0xff] %vm1398_vm0, %v2703_v11  ;;  %v2704_v19 = vmax.f32 %v2262_v63, 0.0  ;;  %v1749_v11 = vadd.f32 %v4551_v6, %v4538_v42 }
 0x1c2   :  { %2829 = vst.msk [vmem:[%s5450_s3 + $0xa0] sm:$0xff] %vm1398_vm0, %v2701_v53  ;;  %v2702_v49 = vmax.f32 %v2254_v27, 0.0 }
 0x1c3   :  { %2832 = vst.msk [vmem:[%s5450_s3 + $0xb8] sm:$0xff] %vm1398_vm0, %v2704_v19 }
 0x1c4   :  { %2830 = vst.msk [vmem:[%s5450_s3 + $0xa8] sm:$0xff] %vm1398_vm0, %v2702_v49  ;;  %v4790_v15 = vpop.f32.mrb[88].mxu0  ;;  %v3320_v23 = vpop.f32.mrb[88].mxu1 }
 0x1c5   :  { %v2275_v29 = vadd.f32 %v3320_v23, %v1730_v56  ;;  %v1803_v43 = vpop.f32.mrb[89].mxu0  ;;  %v2266_v7 = vpop.f32.mrb[89].mxu1 }
 0x1c6   :  { %v2267_v13 = vadd.f32 %v2266_v7, %v1722_v51  ;;  %v4796_v61 = vpop.f32.mrb[90].mxu0  ;;  %v3321_v41 = vpop.f32.mrb[90].mxu1  ;;  %v1754_v43 = vadd.f32 %v4551_v6, %v4559_v20 }
 0x1c7   :  { %v2707_v48 = vmax.f32 %v2275_v29, 0.0  ;;  %v2278_v9 = vadd.f32 %v3321_v41, %v1733_v21  ;;  %v1806_v54 = vpop.f32.mrb[91].mxu0  ;;  %v2269_v25 = vpop.f32.mrb[91].mxu1  ;;  %v1762_v29 = vadd.f32 %v4551_v6, %v4601_v26 }
 0x1c8   :  { %v2705_v1 = vmax.f32 %v2267_v13, 0.0  ;;  %v2270_v33 = vadd.f32 %v2269_v25, %v1725_v2  ;;  %v1765_v13 = vadd.f32 %v4551_v6, %v4613_v3 }
 0x1c9   :  { %2835 = vst.msk [vmem:[%s5450_s3 + $0xd0] sm:$0xff] %vm1398_vm0, %v2707_v48  ;;  %v2708_v55 = vmax.f32 %v2278_v9, 0.0  ;;  %v1757_v9 = vadd.f32 %v4551_v6, %v4571_v30 }
 0x1ca   :  { %2833 = vst.msk [vmem:[%s5450_s3 + $0xc0] sm:$0xff] %vm1398_vm0, %v2705_v1  ;;  %v2706_v59 = vmax.f32 %v2270_v33, 0.0 }
 0x1cb   :  { %2836 = vst.msk [vmem:[%s5450_s3 + $0xd8] sm:$0xff] %vm1398_vm0, %v2708_v55 }
 0x1cc   :  { %2834 = vst.msk [vmem:[%s5450_s3 + $0xc8] sm:$0xff] %vm1398_vm0, %v2706_v59  ;;  %v4818_v24 = vpop.f32.mrb[92].mxu0  ;;  %v3324_v37 = vpop.f32.mrb[92].mxu1 }
 0x1cd   :  { %v2291_v14 = vadd.f32 %v3324_v37, %v1746_v57  ;;  %v1811_v63 = vpop.f32.mrb[93].mxu0  ;;  %v2282_v35 = vpop.f32.mrb[93].mxu1  ;;  %v1778_v37 = vadd.f32 %v4551_v6, %v4685_v32 }
 0x1ce   :  { %v2283_v53 = vadd.f32 %v2282_v35, %v1738_v62  ;;  %v4824_v27 = vpop.f32.mrb[94].mxu0  ;;  %v3325_v31 = vpop.f32.mrb[94].mxu1  ;;  %v1781_v35 = vadd.f32 %v4551_v6, %v4697_v5 }
 0x1cf   :  { %v2711_v19 = vmax.f32 %v2291_v14, 0.0  ;;  %v2294_v49 = vadd.f32 %v3325_v31, %v1749_v11  ;;  %v1814_v56 = vpop.f32.mrb[95].mxu0  ;;  %v2285_v51 = vpop.f32.mrb[95].mxu1  ;;  %v1770_v11 = vadd.f32 %v4551_v6, %v4643_v39  ;;  %v1773_v31 = vadd.f32 %v4551_v6, %v4655_v45 }
 0x1d0   :  { %v2709_v23 = vmax.f32 %v2283_v53, 0.0  ;;  %v2286_v21 = vadd.f32 %v2285_v51, %v1741_v50 }
 0x1d1   :  { %2839 = vst.msk [vmem:[%s5450_s3 + $0xf0] sm:$0xff] %vm1398_vm0, %v2711_v19  ;;  %v2712_v42 = vmax.f32 %v2294_v49, 0.0 }
 0x1d2   :  { %2837 = vst.msk [vmem:[%s5450_s3 + $0xe0] sm:$0xff] %vm1398_vm0, %v2709_v23  ;;  %v2710_v47 = vmax.f32 %v2286_v21, 0.0 }
 0x1d3   :  { %2840 = vst.msk [vmem:[%s5450_s3 + $0xf8] sm:$0xff] %vm1398_vm0, %v2712_v42 }
 0x1d4   :  { %2838 = vst.msk [vmem:[%s5450_s3 + $0xe8] sm:$0xff] %vm1398_vm0, %v2710_v47  ;;  %v4846_v7 = vpop.f32.mrb[96].mxu0  ;;  %v3328_v2 = vpop.f32.mrb[96].mxu1 }
 0x1d5   :  { %v2307_v26 = vadd.f32 %v3328_v2, %v1762_v29  ;;  %v1819_v41 = vpop.f32.mrb[97].mxu0  ;;  %v2298_v48 = vpop.f32.mrb[97].mxu1  ;;  %v1794_v29 = vadd.f32 %v4551_v6, %v4762_v38 }
 0x1d6   :  { %v2299_v54 = vadd.f32 %v2298_v48, %v1754_v43  ;;  %v4852_v25 = vpop.f32.mrb[98].mxu0  ;;  %v3329_v20 = vpop.f32.mrb[98].mxu1  ;;  %v1786_v43 = vadd.f32 %v4551_v6, %v4727_v12 }
 0x1d7   :  { %v2715_v1 = vmax.f32 %v2307_v26, 0.0  ;;  %v2310_v33 = vadd.f32 %v3329_v20, %v1765_v13  ;;  %v1822_v55 = vpop.f32.mrb[99].mxu0  ;;  %v2301_v59 = vpop.f32.mrb[99].mxu1  ;;  %v1797_v26 = vadd.f32 %v4551_v6, %v4768_v60 }
 0x1d8   :  { %v2713_v57 = vmax.f32 %v2299_v54, 0.0  ;;  %v2302_v62 = vadd.f32 %v2301_v59, %v1757_v9  ;;  %v1789_v9 = vadd.f32 %v4551_v6, %v4739_v17 }
 0x1d9   :  { %2843 = vst.msk [vmem:[%s5450_s3 + $0x110] sm:$0xff] %vm1398_vm0, %v2715_v1  ;;  %v2716_v3 = vmax.f32 %v2310_v33, 0.0 }
 0x1da   :  { %2841 = vst.msk [vmem:[%s5450_s3 + $0x100] sm:$0xff] %vm1398_vm0, %v2713_v57  ;;  %v2714_v30 = vmax.f32 %v2302_v62, 0.0 }
 0x1db   :  { %2844 = vst.msk [vmem:[%s5450_s3 + $0x118] sm:$0xff] %vm1398_vm0, %v2716_v3  ;;  %v1810_v3 = vadd.f32 %v4551_v6, %v4818_v24 }
 0x1dc   :  { %2842 = vst.msk [vmem:[%s5450_s3 + $0x108] sm:$0xff] %vm1398_vm0, %v2714_v30  ;;  %v4874_v14 = vpop.f32.mrb[100].mxu0  ;;  %v3332_v63 = vpop.f32.mrb[100].mxu1  ;;  %v1802_v30 = vadd.f32 %v4551_v6, %v4790_v15 }
 0x1dd   :  { %v2323_v32 = vadd.f32 %v3332_v63, %v1778_v37  ;;  %v1827_v50 = vpop.f32.mrb[101].mxu0  ;;  %v2314_v53 = vpop.f32.mrb[101].mxu1  ;;  %v1813_v63 = vadd.f32 %v4551_v6, %v4824_v27 }
 0x1de   :  { %v2315_v19 = vadd.f32 %v2314_v53, %v1770_v11  ;;  %v4880_v49 = vpop.f32.mrb[102].mxu0  ;;  %v3333_v39 = vpop.f32.mrb[102].mxu1  ;;  %v1805_v50 = vadd.f32 %v4551_v6, %v4796_v61 }
 0x1df   :  { %v2719_v56 = vmax.f32 %v2323_v32, 0.0  ;;  %v2326_v51 = vadd.f32 %v3333_v39, %v1781_v35  ;;  %v1830_v23 = vpop.f32.mrb[103].mxu0  ;;  %v2317_v21 = vpop.f32.mrb[103].mxu1 }
 0x1e0   :  { %v2717_v42 = vmax.f32 %v2315_v19, 0.0  ;;  %v2318_v47 = vadd.f32 %v2317_v21, %v1773_v31 }
 0x1e1   :  { %2847 = vst.msk [vmem:[%s5450_s3 + $0x130] sm:$0xff] %vm1398_vm0, %v2719_v56  ;;  %v2720_v5 = vmax.f32 %v2326_v51, 0.0 }
 0x1e2   :  { %2845 = vst.msk [vmem:[%s5450_s3 + $0x120] sm:$0xff] %vm1398_vm0, %v2717_v42  ;;  %v2718_v45 = vmax.f32 %v2318_v47, 0.0  ;;  %v1826_v42 = vadd.f32 %v4551_v6, %v4874_v14  ;;  %v1818_v47 = vadd.f32 %v4551_v6, %v4846_v7 }
 0x1e3   :  { %2848 = vst.msk [vmem:[%s5450_s3 + $0x138] sm:$0xff] %vm1398_vm0, %v2720_v5 }
 0x1e4   :  { %2846 = vst.msk [vmem:[%s5450_s3 + $0x128] sm:$0xff] %vm1398_vm0, %v2718_v45  ;;  %v4902_v2 = vpop.f32.mrb[104].mxu0  ;;  %v3336_v13 = vpop.f32.mrb[104].mxu1 }
 0x1e5   :  { %v2339_v38 = vadd.f32 %v3336_v13, %v1794_v29  ;;  %v1835_v41 = vpop.f32.mrb[105].mxu0  ;;  %v2330_v48 = vpop.f32.mrb[105].mxu1  ;;  %v1829_v29 = vadd.f32 %v4551_v6, %v4880_v49 }
 0x1e6   :  { %v2331_v54 = vadd.f32 %v2330_v48, %v1786_v43  ;;  %v4908_v20 = vpop.f32.mrb[106].mxu0  ;;  %v3337_v12 = vpop.f32.mrb[106].mxu1 }
 0x1e7   :  { %v2723_v1 = vmax.f32 %v2339_v38, 0.0  ;;  %v2342_v33 = vadd.f32 %v3337_v12, %v1797_v26  ;;  %v1838_v55 = vpop.f32.mrb[107].mxu0  ;;  %v2333_v59 = vpop.f32.mrb[107].mxu1  ;;  %v1821_v26 = vadd.f32 %v4551_v6, %v4852_v25 }
 0x1e8   :  { %v2721_v57 = vmax.f32 %v2331_v54, 0.0  ;;  %v2334_v62 = vadd.f32 %v2333_v59, %v1789_v9  ;;  %v1834_v59 = vadd.f32 %v4551_v6, %v4902_v2 }
 0x1e9   :  { %2851 = vst.msk [vmem:[%s5450_s3 + $0x150] sm:$0xff] %vm1398_vm0, %v2723_v1  ;;  %v2724_v60 = vmax.f32 %v2342_v33, 0.0 }
 0x1ea   :  { %2849 = vst.msk [vmem:[%s5450_s3 + $0x140] sm:$0xff] %vm1398_vm0, %v2721_v57  ;;  %v2722_v17 = vmax.f32 %v2334_v62, 0.0 }
 0x1eb   :  { %2852 = vst.msk [vmem:[%s5450_s3 + $0x158] sm:$0xff] %vm1398_vm0, %v2724_v60 }
 0x1ec   :  { %2850 = vst.msk [vmem:[%s5450_s3 + $0x148] sm:$0xff] %vm1398_vm0, %v2722_v17  ;;  %v1841_v37 = vpop.f32.mrb[108].mxu0  ;;  %v3340_v11 = vpop.f32.mrb[108].mxu1 }
 0x1ed   :  { %v2355_v35 = vadd.f32 %v3340_v11, %v1810_v3  ;;  %v1843_v24 = vpop.f32.mrb[109].mxu0  ;;  %v2346_v32 = vpop.f32.mrb[109].mxu1  ;;  %v1842_v55 = vadd.f32 %v4551_v6, %v1841_v37  ;;  %v1837_v37 = vadd.f32 %v4551_v6, %v4908_v20 }
 0x1ee   :  { %v2347_v53 = vadd.f32 %v2346_v32, %v1802_v30  ;;  %v1844_v31 = vpop.f32.mrb[110].mxu0  ;;  %v3341_v19 = vpop.f32.mrb[110].mxu1 }
 0x1ef   :  { %v2727_v15 = vmax.f32 %v2355_v35, 0.0  ;;  %v2358_v39 = vadd.f32 %v3341_v19, %v1813_v63  ;;  %v1846_v56 = vpop.f32.mrb[111].mxu0  ;;  %v2349_v51 = vpop.f32.mrb[111].mxu1  ;;  %v1845_v60 = vadd.f32 %v4551_v6, %v1844_v31 }
 0x1f0   :  { %v2725_v23 = vmax.f32 %v2347_v53, 0.0  ;;  %v2350_v21 = vadd.f32 %v2349_v51, %v1805_v50 }
 0x1f1   :  { %2855 = vst.msk [vmem:[%s5450_s3 + $0x170] sm:$0xff] %vm1398_vm0, %v2727_v15  ;;  %v2728_v27 = vmax.f32 %v2358_v39, 0.0 }
 0x1f2   :  { %2853 = vst.msk [vmem:[%s5450_s3 + $0x160] sm:$0xff] %vm1398_vm0, %v2725_v23  ;;  %v2726_v61 = vmax.f32 %v2350_v21, 0.0 }
 0x1f3   :  { %2856 = vst.msk [vmem:[%s5450_s3 + $0x178] sm:$0xff] %vm1398_vm0, %v2728_v27 }
 0x1f4   :  { %2854 = vst.msk [vmem:[%s5450_s3 + $0x168] sm:$0xff] %vm1398_vm0, %v2726_v61  ;;  %v1849_v5 = vpop.f32.mrb[112].mxu0  ;;  %v3344_v45 = vpop.f32.mrb[112].mxu1 }
 0x1f5   :  { %v2371_v43 = vadd.f32 %v3344_v45, %v1826_v42  ;;  %v1851_v14 = vpop.f32.mrb[113].mxu0  ;;  %v2362_v13 = vpop.f32.mrb[113].mxu1  ;;  %v1850_v39 = vadd.f32 %v4551_v6, %v1849_v5 }
 0x1f6   :  { %v2363_v38 = vadd.f32 %v2362_v13, %v1818_v47  ;;  %v1852_v41 = vpop.f32.mrb[114].mxu0  ;;  %v3345_v48 = vpop.f32.mrb[114].mxu1 }
 0x1f7   :  { %v2731_v7 = vmax.f32 %v2371_v43, 0.0  ;;  %v2374_v9 = vadd.f32 %v3345_v48, %v1829_v29  ;;  %v1854_v54 = vpop.f32.mrb[115].mxu0  ;;  %v2365_v12 = vpop.f32.mrb[115].mxu1  ;;  %v1853_v42 = vadd.f32 %v4551_v6, %v1852_v41 }
 0x1f8   :  { %v2729_v1 = vmax.f32 %v2363_v38, 0.0  ;;  %v2366_v33 = vadd.f32 %v2365_v12, %v1821_v26 }
 0x1f9   :  { %2859 = vst.msk [vmem:[%s5450_s3 + $0x190] sm:$0xff] %vm1398_vm0, %v2731_v7  ;;  %v2732_v49 = vmax.f32 %v2374_v9, 0.0 }
 0x1fa   :  { %2857 = vst.msk [vmem:[%s5450_s3 + $0x180] sm:$0xff] %vm1398_vm0, %v2729_v1  ;;  %v2730_v25 = vmax.f32 %v2366_v33, 0.0 }
 0x1fb   :  { %2860 = vst.msk [vmem:[%s5450_s3 + $0x198] sm:$0xff] %vm1398_vm0, %v2732_v49 }
 0x1fc   :  { %2858 = vst.msk [vmem:[%s5450_s3 + $0x188] sm:$0xff] %vm1398_vm0, %v2730_v25  ;;  %v1857_v57 = vpop.f32.mrb[116].mxu0  ;;  %v3348_v62 = vpop.f32.mrb[116].mxu1 }
 0x1fd   :  { %v2387_v17 = vadd.f32 %v3348_v62, %v1842_v55  ;;  %v1859_v3 = vpop.f32.mrb[117].mxu0  ;;  %v2378_v30 = vpop.f32.mrb[117].mxu1  ;;  %v1858_v15 = vadd.f32 %v4551_v6, %v1857_v57 }
 0x1fe   :  { %v2379_v11 = vadd.f32 %v2378_v30, %v1834_v59  ;;  %v1860_v63 = vpop.f32.mrb[118].mxu0  ;;  %v3349_v35 = vpop.f32.mrb[118].mxu1 }
 0x1ff   :  { %v2735_v24 = vmax.f32 %v2387_v17, 0.0  ;;  %v2390_v2 = vadd.f32 %v3349_v35, %v1845_v60  ;;  %v1862_v32 = vpop.f32.mrb[119].mxu0  ;;  %v2381_v50 = vpop.f32.mrb[119].mxu1  ;;  %v1861_v23 = vadd.f32 %v4551_v6, %v1860_v63 }
 0x200   :  { %v2733_v53 = vmax.f32 %v2379_v11, 0.0  ;;  %v2382_v19 = vadd.f32 %v2381_v50, %v1837_v37 }
 0x201   :  { %2863 = vst.msk [vmem:[%s5450_s3 + $0x1b0] sm:$0xff] %vm1398_vm0, %v2735_v24  ;;  %v2736_v31 = vmax.f32 %v2390_v2, 0.0 }
 0x202   :  { %2861 = vst.msk [vmem:[%s5450_s3 + $0x1a0] sm:$0xff] %vm1398_vm0, %v2733_v53  ;;  %v2734_v20 = vmax.f32 %v2382_v19, 0.0 }
 0x203   :  { %2864 = vst.msk [vmem:[%s5450_s3 + $0x1b8] sm:$0xff] %vm1398_vm0, %v2736_v31 }
 0x204   :  { %2862 = vst.msk [vmem:[%s5450_s3 + $0x1a8] sm:$0xff] %vm1398_vm0, %v2734_v20  ;;  %v1865_v56 = vpop.f32.mrb[120].mxu0  ;;  %v3352_v51 = vpop.f32.mrb[120].mxu1 }
 0x205   :  { %v2403_v21 = vadd.f32 %v3352_v51, %v1858_v15  ;;  %v1867_v27 = vpop.f32.mrb[121].mxu0  ;;  %v2394_v61 = vpop.f32.mrb[121].mxu1  ;;  %v1866_v7 = vadd.f32 %v4551_v6, %v1865_v56 }
 0x206   :  { %v2395_v47 = vadd.f32 %v2394_v61, %v1850_v39  ;;  %v1868_v45 = vpop.f32.mrb[122].mxu0  ;;  %v3353_v29 = vpop.f32.mrb[122].mxu1 }
 0x207   :  { %v2739_v43 = vmax.f32 %v2403_v21, 0.0  ;;  %v2406_v14 = vadd.f32 %v3353_v29, %v1861_v23  ;;  %v1870_v5 = vpop.f32.mrb[123].mxu0  ;;  %v2397_v13 = vpop.f32.mrb[123].mxu1  ;;  %v1869_v49 = vadd.f32 %v4551_v6, %v1868_v45 }
 0x208   :  { %v2737_v26 = vmax.f32 %v2395_v47, 0.0  ;;  %v2398_v38 = vadd.f32 %v2397_v13, %v1853_v42 }
 0x209   :  { %2867 = vst.msk [vmem:[%s5450_s3 + $0x1d0] sm:$0xff] %vm1398_vm0, %v2739_v43  ;;  %v2740_v48 = vmax.f32 %v2406_v14, 0.0 }
 0x20a   :  { %2865 = vst.msk [vmem:[%s5450_s3 + $0x1c0] sm:$0xff] %vm1398_vm0, %v2737_v26  ;;  %v2738_v41 = vmax.f32 %v2398_v38, 0.0 }
 0x20b   :  { %2868 = vst.msk [vmem:[%s5450_s3 + $0x1d8] sm:$0xff] %vm1398_vm0, %v2740_v48 }
 0x20c   :  { %2866 = vst.msk [vmem:[%s5450_s3 + $0x1c8] sm:$0xff] %vm1398_vm0, %v2738_v41  ;;  %v1873_v9 = vpop.f32.mrb[124].mxu0  ;;  %v3356_v54 = vpop.f32.mrb[124].mxu1 }
 0x20d   :  { %v1874_v12 = vadd.f32 %v4551_v6, %v1873_v9  ;;  %v1875_v1 = vpop.f32.mrb[125].mxu0  ;;  %v2410_v33 = vpop.f32.mrb[125].mxu1 }
 0x20e   :  { %v2411_v25 = vadd.f32 %v2410_v33, %v1866_v7  ;;  %v1876_v55 = vpop.f32.mrb[126].mxu0  ;;  %v3357_v59 = vpop.f32.mrb[126].mxu1 }
 0x20f   :  { %v2419_v57 = vadd.f32 %v3356_v54, %v1874_v12  ;;  %v1877_v62 = vadd.f32 %v4551_v6, %v1876_v55  ;;  %v1878_v60 = vpop.f32.mrb[127].mxu0  ;;  %v2413_v17 = vpop.f32.mrb[127].mxu1 }
 0x210   :  { %v2741_v3 = vmax.f32 %v2411_v25, 0.0  ;;  %v2414_v30 = vadd.f32 %v2413_v17, %v1869_v49 }
 0x211   :  { %v2743_v37 = vmax.f32 %v2419_v57, 0.0  ;;  %v2422_v11 = vadd.f32 %v3357_v59, %v1877_v62 }
 0x212   :  { %2869 = vst.msk [vmem:[%s5450_s3 + $0x1e0] sm:$0xff] %vm1398_vm0, %v2741_v3  ;;  %v2742_v63 = vmax.f32 %v2414_v30, 0.0 }
 0x213   :  { %2871 = vst.msk [vmem:[%s5450_s3 + $0x1f0] sm:$0xff] %vm1398_vm0, %v2743_v37  ;;  %v2744_v35 = vmax.f32 %v2422_v11, 0.0 }
 0x214   :  { %2870 = vst.msk [vmem:[%s5450_s3 + $0x1e8] sm:$0xff] %vm1398_vm0, %v2742_v63  ;;  %v1881_v24 = vpop.f32.mrb[128].mxu0  ;;  %v3360_v2 = vpop.f32.mrb[128].mxu1 }
 0x215   :  { %2872 = vst.msk [vmem:[%s5450_s3 + $0x1f8] sm:$0xff] %vm1398_vm0, %v2744_v35  ;;  %v1882_v32 = vadd.f32 %v4551_v6, %v1881_v24  ;;  %v1883_v50 = vpop.f32.mrb[129].mxu0  ;;  %v2426_v53 = vpop.f32.mrb[129].mxu1 }
 0x216   :  { %v1884_v19 = vpop.f32.mrb[130].mxu0  ;;  %v3361_v31 = vpop.f32.mrb[130].mxu1 }
 0x217   :  { %v2427_v20 = vadd.f32 %v2426_v53, %v1882_v32  ;;  %v1885_v15 = vadd.f32 %v4551_v6, %v1884_v19  ;;  %v1886_v39 = vpop.f32.mrb[131].mxu0  ;;  %v2429_v56 = vpop.f32.mrb[131].mxu1 }
 0x219   :  { %v2745_v51 = vmax.f32 %v2427_v20, 0.0  ;;  %v2430_v23 = vadd.f32 %v2429_v56, %v1885_v15 }
 0x21b   :  { %2873 = vst.msk [vmem:[%s5450_s3 + $0x200] sm:$0xff] %vm1398_vm0, %v2745_v51  ;;  %v2746_v21 = vmax.f32 %v2430_v23, 0.0 }
 0x21c   :  { %v1889_v27 = vpop.f32.mrb[132].mxu0  ;;  %v3364_v61 = vpop.f32.mrb[132].mxu1 }
 0x21d   :  { %2874 = vst.msk [vmem:[%s5450_s3 + $0x208] sm:$0xff] %vm1398_vm0, %v2746_v21  ;;  %v1890_v42 = vadd.f32 %v4551_v6, %v1889_v27  ;;  %v1891_v47 = vpop.f32.mrb[133].mxu0  ;;  %v2442_v45 = vpop.f32.mrb[133].mxu1 }
 0x21e   :  { %v1892_v29 = vpop.f32.mrb[134].mxu0  ;;  %v3365_v43 = vpop.f32.mrb[134].mxu1 }
 0x21f   :  { %v2435_v14 = vadd.f32 %v3360_v2, %v1890_v42  ;;  %v1893_v5 = vadd.f32 %v4551_v6, %v1892_v29  ;;  %v1894_v13 = vpop.f32.mrb[135].mxu0  ;;  %v2445_v26 = vpop.f32.mrb[135].mxu1 }
 0x221   :  { %v2747_v38 = vmax.f32 %v2435_v14, 0.0  ;;  %v2438_v48 = vadd.f32 %v3361_v31, %v1893_v5 }
 0x223   :  { %2875 = vst.msk [vmem:[%s5450_s3 + $0x210] sm:$0xff] %vm1398_vm0, %v2747_v38  ;;  %v2748_v41 = vmax.f32 %v2438_v48, 0.0 }
 0x224   :  { %v1897_v7 = vpop.f32.mrb[136].mxu0  ;;  %v3368_v9 = vpop.f32.mrb[136].mxu1 }
 0x225   :  { %2876 = vst.msk [vmem:[%s5450_s3 + $0x218] sm:$0xff] %vm1398_vm0, %v2748_v41  ;;  %v1898_v54 = vadd.f32 %v4551_v6, %v1897_v7  ;;  %v1899_v12 = vpop.f32.mrb[137].mxu0  ;;  %v2458_v1 = vpop.f32.mrb[137].mxu1 }
 0x226   :  { %v1900_v33 = vpop.f32.mrb[138].mxu0  ;;  %v3369_v49 = vpop.f32.mrb[138].mxu1  ;;  %v5108_v12 = vld [vmem:[%s5449_s2] ss:$0 sm:$0xff] }
 0x227   :  { %v2443_v25 = vadd.f32 %v2442_v45, %v1898_v54  ;;  %v1901_v55 = vadd.f32 %v4551_v6, %v1900_v33  ;;  %v1902_v59 = vpop.f32.mrb[139].mxu0  ;;  %v2461_v57 = vpop.f32.mrb[139].mxu1 }
 0x229   :  { %v2749_v62 = vmax.f32 %v2443_v25, 0.0  ;;  %v2446_v60 = vadd.f32 %v2445_v26, %v1901_v55 }
 0x22b   :  { %2877 = vst.msk [vmem:[%s5450_s3 + $0x220] sm:$0xff] %vm1398_vm0, %v2749_v62  ;;  %v2750_v17 = vmax.f32 %v2446_v60, 0.0 }
 0x22c   :  { %v1905_v3 = vpop.f32.mrb[140].mxu0  ;;  %v5062_v30 = vpop.f32.mrb[140].mxu1 }
 0x22d   :  { %2878 = vst.msk [vmem:[%s5450_s3 + $0x228] sm:$0xff] %vm1398_vm0, %v2750_v17  ;;  %v1906_v37 = vadd.f32 %v4551_v6, %v1905_v3  ;;  %v1907_v11 = vpop.f32.mrb[141].mxu0  ;;  %v2474_v63 = vpop.f32.mrb[141].mxu1 }
 0x22e   :  { %v1908_v35 = vpop.f32.mrb[142].mxu0  ;;  %v5069_v24 = vpop.f32.mrb[142].mxu1 }
 0x22f   :  { %v2451_v2 = vadd.f32 %v3364_v61, %v1906_v37  ;;  %v1909_v32 = vadd.f32 %v4551_v6, %v1908_v35  ;;  %v1910_v50 = vpop.f32.mrb[143].mxu0  ;;  %v2477_v53 = vpop.f32.mrb[143].mxu1 }
 0x231   :  { %v2751_v19 = vmax.f32 %v2451_v2, 0.0  ;;  %v2454_v31 = vadd.f32 %v3365_v43, %v1909_v32 }
 0x233   :  { %2879 = vst.msk [vmem:[%s5450_s3 + $0x230] sm:$0xff] %vm1398_vm0, %v2751_v19  ;;  %v2752_v20 = vmax.f32 %v2454_v31, 0.0 }
 0x234   :  { %v1913_v15 = vpop.f32.mrb[144].mxu0  ;;  %v5076_v39 = vpop.f32.mrb[144].mxu1 }
 0x235   :  { %2880 = vst.msk [vmem:[%s5450_s3 + $0x238] sm:$0xff] %vm1398_vm0, %v2752_v20  ;;  %v1914_v56 = vadd.f32 %v4551_v6, %v1913_v15  ;;  %v1915_v51 = vpop.f32.mrb[145].mxu0  ;;  %v5083_v23 = vpop.f32.mrb[145].mxu1 }
 0x236   :  { %v1916_v21 = vpop.f32.mrb[146].mxu0  ;;  %v5085_v27 = vpop.f32.mrb[146].mxu1 }
 0x237   :  { %v2459_v61 = vadd.f32 %v2458_v1, %v1914_v56  ;;  %v1917_v42 = vadd.f32 %v4551_v6, %v1916_v21  ;;  %v1918_v47 = vpop.f32.mrb[147].mxu0  ;;  %v5088_v45 = vpop.f32.mrb[147].mxu1 }
 0x239   :  { %v2753_v29 = vmax.f32 %v2459_v61, 0.0  ;;  %v2462_v43 = vadd.f32 %v2461_v57, %v1917_v42 }
 0x23b   :  { %2881 = vst.msk [vmem:[%s5450_s3 + $0x240] sm:$0xff] %vm1398_vm0, %v2753_v29  ;;  %v2754_v14 = vmax.f32 %v2462_v43, 0.0 }
 0x23c   :  { %v1921_v5 = vpop.f32.mrb[148].mxu0  ;;  %v5094_v13 = vpop.f32.mrb[148].mxu1 }
 0x23d   :  { %2882 = vst.msk [vmem:[%s5450_s3 + $0x248] sm:$0xff] %vm1398_vm0, %v2754_v14  ;;  %v1922_v26 = vadd.f32 %v4551_v6, %v1921_v5  ;;  %v1923_v38 = vpop.f32.mrb[149].mxu0  ;;  %v5101_v48 = vpop.f32.mrb[149].mxu1  ;;  %v2018_v14 = vadd.f32 %v5108_v12, %v4222_v16 }
 0x23e   :  { %v1924_v41 = vpop.f32.mrb[150].mxu0  ;;  %v5103_v7 = vpop.f32.mrb[150].mxu1 }
 0x23f   :  { %v2467_v54 = vadd.f32 %v3368_v9, %v1922_v26  ;;  %v1925_v1 = vadd.f32 %v5108_v12, %v1924_v41  ;;  %v1926_v33 = vpop.f32.mrb[151].mxu0  ;;  %v5111_v25 = vpop.f32.mrb[151].mxu1  ;;  %v2021_v41 = vadd.f32 %v5108_v12, %v4232_v22 }
 0x240   :  { %v2013_v33 = vadd.f32 %v5108_v12, %v4210_v10 }
 0x241   :  { %v2755_v55 = vmax.f32 %v2467_v54, 0.0  ;;  %v2470_v59 = vadd.f32 %v3369_v49, %v1925_v1 }
 0x243   :  { %2883 = vst.msk [vmem:[%s5450_s3 + $0x250] sm:$0xff] %vm1398_vm0, %v2755_v55  ;;  %v2756_v6 = vmax.f32 %v2470_v59, 0.0 }
 0x244   :  { %v1929_v57 = vpop.f32.mrb[152].mxu0  ;;  %v5117_v9 = vpop.f32.mrb[152].mxu1 }
 0x245   :  { %2884 = vst.msk [vmem:[%s5450_s3 + $0x258] sm:$0xff] %vm1398_vm0, %v2756_v6  ;;  %v1930_v62 = vadd.f32 %v5108_v12, %v1929_v57  ;;  %v1931_v60 = vpop.f32.mrb[153].mxu0  ;;  %v5124_v17 = vpop.f32.mrb[153].mxu1 }
 0x246   :  { %v1932_v49 = vpop.f32.mrb[154].mxu0  ;;  %v5126_v3 = vpop.f32.mrb[154].mxu1 }
 0x247   :  { %v2475_v37 = vadd.f32 %v2474_v63, %v1930_v62  ;;  %v1933_v11 = vadd.f32 %v5108_v12, %v1932_v49  ;;  %v1934_v35 = vpop.f32.mrb[155].mxu0  ;;  %v5129_v2 = vpop.f32.mrb[155].mxu1 }
 0x249   :  { %v2757_v32 = vmax.f32 %v2475_v37, 0.0  ;;  %v2478_v50 = vadd.f32 %v2477_v53, %v1933_v11 }
 0x24b   :  { %2885 = vst.msk [vmem:[%s5450_s3 + $0x260] sm:$0xff] %vm1398_vm0, %v2757_v32  ;;  %v2758_v19 = vmax.f32 %v2478_v50, 0.0  ;;  %v2034_v50 = vadd.f32 %v5108_v12, %v4266_v40 }
 0x24c   :  { %v1937_v31 = vpop.f32.mrb[156].mxu0  ;;  %v5135_v20 = vpop.f32.mrb[156].mxu1 }
 0x24d   :  { %2886 = vst.msk [vmem:[%s5450_s3 + $0x268] sm:$0xff] %vm1398_vm0, %v2758_v19  ;;  %v1938_v63 = vadd.f32 %v5108_v12, %v1937_v31  ;;  %v1939_v15 = vpop.f32.mrb[157].mxu0  ;;  %v5142_v56 = vpop.f32.mrb[157].mxu1 }
 0x24e   :  { %v1940_v53 = vpop.f32.mrb[158].mxu0  ;;  %v5144_v51 = vpop.f32.mrb[158].mxu1 }
 0x24f   :  { %v2483_v21 = vadd.f32 %v5062_v30, %v1938_v63  ;;  %v1941_v61 = vadd.f32 %v5108_v12, %v1940_v53  ;;  %v1942_v42 = vpop.f32.mrb[159].mxu0  ;;  %v5148_v47 = vpop.f32.mrb[159].mxu1  ;;  %v2010_v30 = vadd.f32 %v5108_v12, %v4200_v4  ;;  %v2037_v63 = vadd.f32 %v5108_v12, %v4276_v46 }
 0x251   :  { %v2759_v29 = vmax.f32 %v2483_v21, 0.0  ;;  %v2486_v43 = vadd.f32 %v5069_v24, %v1941_v61  ;;  %v2029_v61 = vadd.f32 %v5108_v12, %v4254_v34 }
 0x253   :  { %2887 = vst.msk [vmem:[%s5450_s3 + $0x270] sm:$0xff] %vm1398_vm0, %v2759_v29  ;;  %v2760_v5 = vmax.f32 %v2486_v43, 0.0 }
 0x254   :  { %v1945_v26 = vpop.f32.mrb[160].mxu0  ;;  %v3392_v38 = vpop.f32.mrb[160].mxu1 }
 0x255   :  { %2888 = vst.msk [vmem:[%s5450_s3 + $0x278] sm:$0xff] %vm1398_vm0, %v2760_v5  ;;  %v1946_v16 = vadd.f32 %v5108_v12, %v1945_v26  ;;  %v2563_v24 = vadd.f32 %v3392_v38, %v2018_v14  ;;  %v1947_v54 = vpop.f32.mrb[161].mxu0  ;;  %v2554_v1 = vpop.f32.mrb[161].mxu1 }
 0x256   :  { %v2555_v55 = vadd.f32 %v2554_v1, %v2010_v30  ;;  %v1948_v4 = vpop.f32.mrb[162].mxu0  ;;  %v3393_v59 = vpop.f32.mrb[162].mxu1  ;;  %v2050_v1 = vadd.f32 %v5108_v12, %v4310_v0 }
 0x257   :  { %v2491_v6 = vadd.f32 %v5083_v23, %v1946_v16  ;;  %v2779_v57 = vmax.f32 %v2563_v24, 0.0  ;;  %v1949_v22 = vadd.f32 %v5108_v12, %v1948_v4  ;;  %v2566_v62 = vadd.f32 %v3393_v59, %v2021_v41  ;;  %v1950_v60 = vpop.f32.mrb[163].mxu0  ;;  %v2557_v49 = vpop.f32.mrb[163].mxu1 }
 0x258   :  { %v2777_v37 = vmax.f32 %v2555_v55, 0.0  ;;  %v2558_v11 = vadd.f32 %v2557_v49, %v2013_v33  ;;  %v2053_v4 = vadd.f32 %v5108_v12, %v4320_v8 }
 0x259   :  { %v2761_v35 = vmax.f32 %v2491_v6, 0.0  ;;  %2907 = vst.msk [vmem:[%s5450_s3 + $0x310] sm:$0xff] %vm1398_vm0, %v2779_v57  ;;  %v2494_v10 = vadd.f32 %v5088_v45, %v1949_v22  ;;  %v2780_v32 = vmax.f32 %v2566_v62, 0.0  ;;  %v2026_v45 = vadd.f32 %v5108_v12, %v4244_v28 }
 0x25a   :  { %2905 = vst.msk [vmem:[%s5450_s3 + $0x300] sm:$0xff] %vm1398_vm0, %v2777_v37  ;;  %v2778_v23 = vmax.f32 %v2558_v11, 0.0  ;;  %v2045_v22 = vadd.f32 %v5108_v12, %v4298_v58 }
 0x25b   :  { %2889 = vst.msk [vmem:[%s5450_s3 + $0x280] sm:$0xff] %vm1398_vm0, %v2761_v35  ;;  %v2762_v19 = vmax.f32 %v2494_v10, 0.0  ;;  %2908 = vst.msk [vmem:[%s5450_s3 + $0x318] sm:$0xff] %vm1398_vm0, %v2780_v32 }
 0x25c   :  { %2906 = vst.msk [vmem:[%s5450_s3 + $0x308] sm:$0xff] %vm1398_vm0, %v2778_v23  ;;  %v1953_v40 = vpop.f32.mrb[164].mxu0  ;;  %v3396_v31 = vpop.f32.mrb[164].mxu1 }
 0x25d   :  { %2890 = vst.msk [vmem:[%s5450_s3 + $0x288] sm:$0xff] %vm1398_vm0, %v2762_v19  ;;  %v1954_v15 = vadd.f32 %v5108_v12, %v1953_v40  ;;  %v2579_v53 = vadd.f32 %v3396_v31, %v2034_v50  ;;  %v1955_v21 = vpop.f32.mrb[165].mxu0  ;;  %v2570_v28 = vpop.f32.mrb[165].mxu1  ;;  %v2066_v40 = vadd.f32 %v5108_v12, %v4354_v36 }
 0x25e   :  { %v2571_v42 = vadd.f32 %v2570_v28, %v2026_v45  ;;  %v1956_v29 = vpop.f32.mrb[166].mxu0  ;;  %v3397_v43 = vpop.f32.mrb[166].mxu1 }
 0x25f   :  { %v2499_v14 = vadd.f32 %v5076_v39, %v1954_v15  ;;  %v2783_v5 = vmax.f32 %v2579_v53, 0.0  ;;  %v1957_v46 = vadd.f32 %v5108_v12, %v1956_v29  ;;  %v2582_v30 = vadd.f32 %v3397_v43, %v2037_v63  ;;  %v1958_v26 = vpop.f32.mrb[167].mxu0  ;;  %v2573_v38 = vpop.f32.mrb[167].mxu1 }
 0x260   :  { %v2781_v41 = vmax.f32 %v2571_v42, 0.0  ;;  %v2574_v16 = vadd.f32 %v2573_v38, %v2029_v61  ;;  %v2069_v15 = vadd.f32 %v5108_v12, %v4364_v44  ;;  %v5468_v61 = vld [vmem:[#allocation2_spill] sm:$0xff] }
 0x261   :  { %v2763_v24 = vmax.f32 %v2499_v14, 0.0  ;;  %2911 = vst.msk [vmem:[%s5450_s3 + $0x330] sm:$0xff] %vm1398_vm0, %v2783_v5  ;;  %v2502_v34 = vadd.f32 %v5085_v27, %v1957_v46  ;;  %v2784_v54 = vmax.f32 %v2582_v30, 0.0  ;;  %v2042_v27 = vadd.f32 %v5108_v12, %v4288_v52 }
 0x262   :  { %2909 = vst.msk [vmem:[%s5450_s3 + $0x320] sm:$0xff] %vm1398_vm0, %v2781_v41  ;;  %v2782_v39 = vmax.f32 %v2574_v16, 0.0  ;;  %v2061_v42 = vadd.f32 %v5108_v12, %v5468_v61 }
 0x263   :  { %2891 = vst.msk [vmem:[%s5450_s3 + $0x290] sm:$0xff] %vm1398_vm0, %v2763_v24  ;;  %v2764_v33 = vmax.f32 %v2502_v34, 0.0  ;;  %2912 = vst.msk [vmem:[%s5450_s3 + $0x338] sm:$0xff] %vm1398_vm0, %v2784_v54 }
 0x264   :  { %2910 = vst.msk [vmem:[%s5450_s3 + $0x328] sm:$0xff] %vm1398_vm0, %v2782_v39  ;;  %v1961_v0 = vpop.f32.mrb[168].mxu0  ;;  %v3400_v55 = vpop.f32.mrb[168].mxu1  ;;  %v5469_v39 = vld [vmem:[#allocation5_spill] sm:$0xff] }
 0x265   :  { %2892 = vst.msk [vmem:[%s5450_s3 + $0x298] sm:$0xff] %vm1398_vm0, %v2764_v33  ;;  %v1962_v59 = vadd.f32 %v5108_v12, %v1961_v0  ;;  %v2595_v6 = vadd.f32 %v3400_v55, %v2050_v1  ;;  %v1963_v57 = vpop.f32.mrb[169].mxu0  ;;  %v2586_v52 = vpop.f32.mrb[169].mxu1  ;;  %v2082_v1 = vadd.f32 %v5108_v12, %v5469_v39 }
 0x266   :  { %v2587_v62 = vadd.f32 %v2586_v52, %v2042_v27  ;;  %v1964_v60 = vpop.f32.mrb[170].mxu0  ;;  %v3401_v49 = vpop.f32.mrb[170].mxu1 }
 0x267   :  { %v2507_v37 = vadd.f32 %v5101_v48, %v1962_v59  ;;  %v2787_v11 = vmax.f32 %v2595_v6, 0.0  ;;  %v1965_v8 = vadd.f32 %v5108_v12, %v1964_v60  ;;  %v2598_v35 = vadd.f32 %v3401_v49, %v2053_v4  ;;  %v1966_v10 = vpop.f32.mrb[171].mxu0  ;;  %v2589_v32 = vpop.f32.mrb[171].mxu1  ;;  %v5471_v4 = vld [vmem:[#allocation6_spill] sm:$0xff] }
 0x268   :  { %v2785_v23 = vmax.f32 %v2587_v62, 0.0  ;;  %v2590_v50 = vadd.f32 %v2589_v32, %v2045_v22  ;;  %v2085_v59 = vadd.f32 %v5108_v12, %v5471_v4  ;;  %v5472_v62 = vld [vmem:[#allocation4_spill] sm:$0xff] }
 0x269   :  { %v2765_v19 = vmax.f32 %v2507_v37, 0.0  ;;  %2915 = vst.msk [vmem:[%s5450_s3 + $0x350] sm:$0xff] %vm1398_vm0, %v2787_v11  ;;  %v2510_v58 = vadd.f32 %v5111_v25, %v1965_v8  ;;  %v2788_v45 = vmax.f32 %v2598_v35, 0.0  ;;  %v2058_v25 = vadd.f32 %v5108_v12, %v4332_v18 }
 0x26a   :  { %2913 = vst.msk [vmem:[%s5450_s3 + $0x340] sm:$0xff] %vm1398_vm0, %v2785_v23  ;;  %v2786_v48 = vmax.f32 %v2590_v50, 0.0  ;;  %v2077_v60 = vadd.f32 %v5108_v12, %v5472_v62 }
 0x26b   :  { %2893 = vst.msk [vmem:[%s5450_s3 + $0x2a0] sm:$0xff] %vm1398_vm0, %v2765_v19  ;;  %v2766_v31 = vmax.f32 %v2510_v58, 0.0  ;;  %2916 = vst.msk [vmem:[%s5450_s3 + $0x358] sm:$0xff] %vm1398_vm0, %v2788_v45 }
 0x26c   :  { %2914 = vst.msk [vmem:[%s5450_s3 + $0x348] sm:$0xff] %vm1398_vm0, %v2786_v48  ;;  %v1969_v36 = vpop.f32.mrb[172].mxu0  ;;  %v3404_v63 = vpop.f32.mrb[172].mxu1 }
 0x26d   :  { %2894 = vst.msk [vmem:[%s5450_s3 + $0x2a8] sm:$0xff] %vm1398_vm0, %v2766_v31  ;;  %v1970_v53 = vadd.f32 %v5108_v12, %v1969_v36  ;;  %v2611_v21 = vadd.f32 %v3404_v63, %v2066_v40  ;;  %v1971_v28 = vpop.f32.mrb[173].mxu0  ;;  %v2602_v18 = vpop.f32.mrb[173].mxu1  ;;  %v5473_v31 = vld [vmem:[#allocation9_spill] sm:$0xff] }
 0x26e   :  { %v2603_v29 = vadd.f32 %v2602_v18, %v2058_v25  ;;  %v1972_v43 = vpop.f32.mrb[174].mxu0  ;;  %v3405_v14 = vpop.f32.mrb[174].mxu1  ;;  %v2098_v25 = vadd.f32 %v5108_v12, %v5473_v31  ;;  %v5481_v31 = vld [vmem:[#allocation17_spill] sm:$0xff] }
 0x26f   :  { %v2515_v5 = vadd.f32 %v5094_v13, %v1970_v53  ;;  %v2791_v46 = vmax.f32 %v2611_v21, 0.0  ;;  %v1973_v44 = vadd.f32 %v5108_v12, %v1972_v43  ;;  %v2614_v30 = vadd.f32 %v3405_v14, %v2069_v15  ;;  %v1974_v26 = vpop.f32.mrb[175].mxu0  ;;  %v2605_v38 = vpop.f32.mrb[175].mxu1  ;;  %v5475_v21 = vld [vmem:[#allocation10_spill] sm:$0xff]  ;;  %v5476_v43 = vld [vmem:[#allocation8_spill] sm:$0xff] }
 0x270   :  { %v2789_v41 = vmax.f32 %v2603_v29, 0.0  ;;  %v2606_v16 = vadd.f32 %v2605_v38, %v2061_v42  ;;  %v2101_v28 = vadd.f32 %v5108_v12, %v5475_v21  ;;  %v2093_v14 = vadd.f32 %v5108_v12, %v5476_v43 }
 0x271   :  { %v2767_v24 = vmax.f32 %v2515_v5, 0.0  ;;  %2919 = vst.msk [vmem:[%s5450_s3 + $0x370] sm:$0xff] %vm1398_vm0, %v2791_v46  ;;  %v2518_v34 = vadd.f32 %v5103_v7, %v1973_v44  ;;  %v2792_v54 = vmax.f32 %v2614_v30, 0.0  ;;  %v5470_v7 = vld [vmem:[#allocation3_spill] sm:$0xff] }
 0x272   :  { %2917 = vst.msk [vmem:[%s5450_s3 + $0x360] sm:$0xff] %vm1398_vm0, %v2789_v41  ;;  %v2790_v13 = vmax.f32 %v2606_v16, 0.0  ;;  %v2074_v27 = vadd.f32 %v5108_v12, %v5470_v7 }
 0x273   :  { %2895 = vst.msk [vmem:[%s5450_s3 + $0x2b0] sm:$0xff] %vm1398_vm0, %v2767_v24  ;;  %v2768_v33 = vmax.f32 %v2518_v34, 0.0  ;;  %2920 = vst.msk [vmem:[%s5450_s3 + $0x378] sm:$0xff] %vm1398_vm0, %v2792_v54 }
 0x274   :  { %2918 = vst.msk [vmem:[%s5450_s3 + $0x368] sm:$0xff] %vm1398_vm0, %v2790_v13  ;;  %v1977_v0 = vpop.f32.mrb[176].mxu0  ;;  %v3408_v55 = vpop.f32.mrb[176].mxu1 }
 0x275   :  { %2896 = vst.msk [vmem:[%s5450_s3 + $0x2b8] sm:$0xff] %vm1398_vm0, %v2768_v33  ;;  %v1978_v6 = vadd.f32 %v5108_v12, %v1977_v0  ;;  %v2627_v57 = vadd.f32 %v3408_v55, %v2082_v1  ;;  %v1979_v52 = vpop.f32.mrb[177].mxu0  ;;  %v2618_v22 = vpop.f32.mrb[177].mxu1  ;;  %v5477_v33 = vld [vmem:[#allocation13_spill] sm:$0xff] }
 0x276   :  { %v2619_v49 = vadd.f32 %v2618_v22, %v2074_v27  ;;  %v1980_v37 = vpop.f32.mrb[178].mxu0  ;;  %v3409_v11 = vpop.f32.mrb[178].mxu1  ;;  %v2114_v7 = vadd.f32 %v5108_v12, %v5477_v33 }
 0x277   :  { %v2523_v8 = vadd.f32 %v5124_v17, %v1978_v6  ;;  %v2795_v35 = vmax.f32 %v2627_v57, 0.0  ;;  %v1981_v10 = vadd.f32 %v5108_v12, %v1980_v37  ;;  %v2630_v32 = vadd.f32 %v3409_v11, %v2085_v59  ;;  %v1982_v23 = vpop.f32.mrb[179].mxu0  ;;  %v2621_v50 = vpop.f32.mrb[179].mxu1  ;;  %v5479_v59 = vld [vmem:[#allocation14_spill] sm:$0xff] }
 0x278   :  { %v2793_v19 = vmax.f32 %v2619_v49, 0.0  ;;  %v2622_v58 = vadd.f32 %v2621_v50, %v2077_v60  ;;  %v2117_v6 = vadd.f32 %v5108_v12, %v5479_v59  ;;  %v5480_v60 = vld [vmem:[#allocation12_spill] sm:$0xff] }
 0x279   :  { %v2769_v45 = vmax.f32 %v2523_v8, 0.0  ;;  %2923 = vst.msk [vmem:[%s5450_s3 + $0x390] sm:$0xff] %vm1398_vm0, %v2795_v35  ;;  %v2526_v48 = vadd.f32 %v5129_v2, %v1981_v10  ;;  %v2796_v40 = vmax.f32 %v2630_v32, 0.0  ;;  %v5474_v2 = vld [vmem:[#allocation7_spill] sm:$0xff]  ;;  %v2109_v49 = vadd.f32 %v5108_v12, %v5480_v60 }
 0x27a   :  { %2921 = vst.msk [vmem:[%s5450_s3 + $0x380] sm:$0xff] %vm1398_vm0, %v2793_v19  ;;  %v2794_v17 = vmax.f32 %v2622_v58, 0.0  ;;  %v2090_v63 = vadd.f32 %v5108_v12, %v5474_v2 }
 0x27b   :  { %2897 = vst.msk [vmem:[%s5450_s3 + $0x2c0] sm:$0xff] %vm1398_vm0, %v2769_v45  ;;  %v2770_v36 = vmax.f32 %v2526_v48, 0.0  ;;  %2924 = vst.msk [vmem:[%s5450_s3 + $0x398] sm:$0xff] %vm1398_vm0, %v2796_v40 }
 0x27c   :  { %2922 = vst.msk [vmem:[%s5450_s3 + $0x388] sm:$0xff] %vm1398_vm0, %v2794_v17  ;;  %v1985_v15 = vpop.f32.mrb[180].mxu0  ;;  %v3412_v53 = vpop.f32.mrb[180].mxu1 }
 0x27d   :  { %2898 = vst.msk [vmem:[%s5450_s3 + $0x2c8] sm:$0xff] %vm1398_vm0, %v2770_v36  ;;  %v1986_v18 = vadd.f32 %v5108_v12, %v1985_v15  ;;  %v2643_v61 = vadd.f32 %v3412_v53, %v2098_v25  ;;  %v1987_v42 = vpop.f32.mrb[181].mxu0  ;;  %v2634_v29 = vpop.f32.mrb[181].mxu1  ;;  %v2130_v25 = vadd.f32 %v5108_v12, %v5481_v31  ;;  %v5483_v53 = vld [vmem:[#allocation18_spill] sm:$0xff] }
 0x27e   :  { %v2635_v5 = vadd.f32 %v2634_v29, %v2090_v63  ;;  %v1988_v46 = vpop.f32.mrb[182].mxu0  ;;  %v3413_v44 = vpop.f32.mrb[182].mxu1  ;;  %v2133_v21 = vadd.f32 %v5108_v12, %v5483_v53  ;;  %v5484_v29 = vld [vmem:[#allocation16_spill] sm:$0xff] }
 0x27f   :  { %v2531_v30 = vadd.f32 %v5117_v9, %v1986_v18  ;;  %v2799_v26 = vmax.f32 %v2643_v61, 0.0  ;;  %v1989_v38 = vadd.f32 %v5108_v12, %v1988_v46  ;;  %v2646_v41 = vadd.f32 %v3413_v44, %v2101_v28  ;;  %v1990_v16 = vpop.f32.mrb[183].mxu0  ;;  %v2637_v24 = vpop.f32.mrb[183].mxu1 }
 0x280   :  { %v2797_v34 = vmax.f32 %v2635_v5, 0.0  ;;  %v2638_v54 = vadd.f32 %v2637_v24, %v2093_v14  ;;  %v2125_v43 = vadd.f32 %v5108_v12, %v5484_v29 }
 0x281   :  { %v2771_v13 = vmax.f32 %v2531_v30, 0.0  ;;  %2927 = vst.msk [vmem:[%s5450_s3 + $0x3b0] sm:$0xff] %vm1398_vm0, %v2799_v26  ;;  %v2534_v39 = vadd.f32 %v5126_v3, %v1989_v38  ;;  %v2800_v1 = vmax.f32 %v2646_v41, 0.0  ;;  %v5478_v3 = vld [vmem:[#allocation11_spill] sm:$0xff] }
 0x282   :  { %2925 = vst.msk [vmem:[%s5450_s3 + $0x3a0] sm:$0xff] %vm1398_vm0, %v2797_v34  ;;  %v2798_v9 = vmax.f32 %v2638_v54, 0.0  ;;  %v2106_v0 = vadd.f32 %v5108_v12, %v5478_v3 }
 0x283   :  { %2899 = vst.msk [vmem:[%s5450_s3 + $0x2d0] sm:$0xff] %vm1398_vm0, %v2771_v13  ;;  %v2772_v27 = vmax.f32 %v2534_v39, 0.0  ;;  %2928 = vst.msk [vmem:[%s5450_s3 + $0x3b8] sm:$0xff] %vm1398_vm0, %v2800_v1 }
 0x284   :  { %2926 = vst.msk [vmem:[%s5450_s3 + $0x3a8] sm:$0xff] %vm1398_vm0, %v2798_v9  ;;  %v1993_v55 = vpop.f32.mrb[184].mxu0  ;;  %v3416_v4 = vpop.f32.mrb[184].mxu1 }
 0x285   :  { %2900 = vst.msk [vmem:[%s5450_s3 + $0x2d8] sm:$0xff] %vm1398_vm0, %v2772_v27  ;;  %v1994_v57 = vadd.f32 %v5108_v12, %v1993_v55  ;;  %v2659_v52 = vadd.f32 %v3416_v4, %v2114_v7  ;;  %v1995_v22 = vpop.f32.mrb[185].mxu0  ;;  %v2650_v62 = vpop.f32.mrb[185].mxu1 }
 0x286   :  { %v2651_v37 = vadd.f32 %v2650_v62, %v2106_v0  ;;  %v1996_v11 = vpop.f32.mrb[186].mxu0  ;;  %v3417_v8 = vpop.f32.mrb[186].mxu1 }
 0x287   :  { %v2539_v35 = vadd.f32 %v5142_v56, %v1994_v57  ;;  %v2803_v10 = vmax.f32 %v2659_v52, 0.0  ;;  %v1997_v32 = vadd.f32 %v5108_v12, %v1996_v11  ;;  %v2662_v23 = vadd.f32 %v3417_v8, %v2117_v6  ;;  %v1998_v50 = vpop.f32.mrb[187].mxu0  ;;  %v2653_v19 = vpop.f32.mrb[187].mxu1 }
 0x288   :  { %v2801_v58 = vmax.f32 %v2651_v37, 0.0  ;;  %v2654_v45 = vadd.f32 %v2653_v19, %v2109_v49 }
 0x289   :  { %v2773_v48 = vmax.f32 %v2539_v35, 0.0  ;;  %2931 = vst.msk [vmem:[%s5450_s3 + $0x3d0] sm:$0xff] %vm1398_vm0, %v2803_v10  ;;  %v2542_v40 = vadd.f32 %v5148_v47, %v1997_v32  ;;  %v2804_v17 = vmax.f32 %v2662_v23, 0.0  ;;  %v5482_v47 = vld [vmem:[#allocation15_spill] sm:$0xff] }
 0x28a   :  { %2929 = vst.msk [vmem:[%s5450_s3 + $0x3c0] sm:$0xff] %vm1398_vm0, %v2801_v58  ;;  %v2802_v56 = vmax.f32 %v2654_v45, 0.0  ;;  %v2122_v2 = vadd.f32 %v5108_v12, %v5482_v47 }
 0x28b   :  { %2901 = vst.msk [vmem:[%s5450_s3 + $0x2e0] sm:$0xff] %vm1398_vm0, %v2773_v48  ;;  %v2774_v36 = vmax.f32 %v2542_v40, 0.0  ;;  %2932 = vst.msk [vmem:[%s5450_s3 + $0x3d8] sm:$0xff] %vm1398_vm0, %v2804_v17 }
 0x28c   :  { %2930 = vst.msk [vmem:[%s5450_s3 + $0x3c8] sm:$0xff] %vm1398_vm0, %v2802_v56  ;;  %v2001_v63 = vpop.f32.mrb[188].mxu0  ;;  %v3420_v15 = vpop.f32.mrb[188].mxu1 }
 0x28d   :  { %2902 = vst.msk [vmem:[%s5450_s3 + $0x2e8] sm:$0xff] %vm1398_vm0, %v2774_v36  ;;  %v2002_v28 = vadd.f32 %v5108_v12, %v2001_v63  ;;  %v2675_v18 = vadd.f32 %v3420_v15, %v2130_v25  ;;  %v2003_v61 = vpop.f32.mrb[189].mxu0  ;;  %v2666_v42 = vpop.f32.mrb[189].mxu1 }
 0x28e   :  { %v2667_v14 = vadd.f32 %v2666_v42, %v2122_v2  ;;  %v2004_v5 = vpop.f32.mrb[190].mxu0  ;;  %v3421_v46 = vpop.f32.mrb[190].mxu1 }
 0x28f   :  { %v2547_v44 = vadd.f32 %v5135_v20, %v2002_v28  ;;  %v2807_v30 = vmax.f32 %v2675_v18, 0.0  ;;  %v2005_v26 = vadd.f32 %v5108_v12, %v2004_v5  ;;  %v2678_v38 = vadd.f32 %v3421_v46, %v2133_v21  ;;  %v2006_v41 = vpop.f32.mrb[191].mxu0  ;;  %v2669_v16 = vpop.f32.mrb[191].mxu1 }
 0x290   :  { %v2805_v24 = vmax.f32 %v2667_v14, 0.0  ;;  %v2670_v34 = vadd.f32 %v2669_v16, %v2125_v43 }
 0x291   :  { %v2775_v54 = vmax.f32 %v2547_v44, 0.0  ;;  %2935 = vst.msk [vmem:[%s5450_s3 + $0x3f0] sm:$0xff] %vm1398_vm0, %v2807_v30  ;;  %v2550_v13 = vadd.f32 %v5144_v51, %v2005_v26  ;;  %v2808_v39 = vmax.f32 %v2678_v38, 0.0 }
 0x292   :  { %2933 = vst.msk [vmem:[%s5450_s3 + $0x3e0] sm:$0xff] %vm1398_vm0, %v2805_v24  ;;  %v2806_v12 = vmax.f32 %v2670_v34, 0.0 }
 0x293   :  { %2903 = vst.msk [vmem:[%s5450_s3 + $0x2f0] sm:$0xff] %vm1398_vm0, %v2775_v54  ;;  %v2776_v20 = vmax.f32 %v2550_v13, 0.0  ;;  %2936 = vst.msk [vmem:[%s5450_s3 + $0x3f8] sm:$0xff] %vm1398_vm0, %v2808_v39 }
 0x294   :  { %2934 = vst.msk [vmem:[%s5450_s3 + $0x3e8] sm:$0xff] %vm1398_vm0, %v2806_v12 }
 0x295   :  { %2904 = vst.msk [vmem:[%s5450_s3 + $0x2f8] sm:$0xff] %vm1398_vm0, %v2776_v20 }

</bundles_post_ra>
